<compile_context>
chip_gen: v5e
topology: v5e:2x2
jax: 0.10.0
libtpu: 0.0.40
codegen_flags: <defaults>
</compile_context>

<pallas_src>
import jax
import jax.numpy as jnp
import numpy as np
from jax.experimental import pallas as pl
from jax.experimental.pallas import tpu as pltpu

X_DIM = 28 * 28       # 784
H_DIM1 = 128
H_DIM2 = 128
Z_DIM = 10
Z_PAD = 128           # lane-dense padded output width


def _round_up(x, m):
    return (x + m - 1) // m * m


def _mlp_kernel(x_ref, w1_ref, b1_ref, w2_ref, b2_ref, w3_ref, b3_ref, o_ref):
    """Linear -> ReLU -> Linear -> ReLU -> Linear on one (TILE_M, 784) row tile.

    x / weights are bf16; every dot accumulates in f32 on the MXU and the
    bias + ReLU run on the f32 accumulator.
    """
    x = x_ref[...]                                                        # (tm, 784) bf16
    h = jnp.dot(x, w1_ref[...], preferred_element_type=jnp.float32) + b1_ref[...]
    h = jnp.maximum(h, 0.0).astype(jnp.bfloat16)                          # (tm, 128)
    h = jnp.dot(h, w2_ref[...], preferred_element_type=jnp.float32) + b2_ref[...]
    h = jnp.maximum(h, 0.0).astype(jnp.bfloat16)                          # (tm, 128)
    z = jnp.dot(h, w3_ref[...], preferred_element_type=jnp.float32) + b3_ref[...]
    o_ref[...] = z.astype(o_ref.dtype)                                    # (tm, 128) f32, lane-dense


def _mlp_pallas(x2d, kparams, *, tile_m):
    """x2d: (N, 784) bf16 with N % tile_m == 0  ->  (N, Z_PAD) f32."""
    w1, b1, w2, b2, w3p, b3p = kparams
    n = x2d.shape[0]
    grid = (n // tile_m,)

    row_spec = pl.BlockSpec((tile_m, X_DIM), lambda i: (i, 0))
    out_spec = pl.BlockSpec((tile_m, Z_PAD), lambda i: (i, 0))

    def resident(shape):
        # Constant block index across the grid -> fetched once, stays in VMEM.
        return pl.BlockSpec(shape, lambda i: (0, 0))

    flops = 2 * n * (X_DIM * H_DIM1 + H_DIM1 * H_DIM2 + H_DIM2 * Z_PAD)
    bytes_accessed = (n * X_DIM * 2                      # bf16 input stream
                      + n * Z_PAD * 4                    # f32 output
                      + (X_DIM * H_DIM1 + H_DIM1 * H_DIM2 + H_DIM2 * Z_PAD) * 2
                      + 3 * Z_PAD * 4)

    return pl.pallas_call(
        _mlp_kernel,
        out_shape=jax.ShapeDtypeStruct((n, Z_PAD), jnp.float32),
        grid=grid,
        in_specs=[
            row_spec,
            resident((X_DIM, H_DIM1)), resident((1, H_DIM1)),
            resident((H_DIM1, H_DIM2)), resident((1, H_DIM2)),
            resident((H_DIM2, Z_PAD)), resident((1, Z_PAD)),
        ],
        out_specs=out_spec,
        compiler_params=pltpu.CompilerParams(
            dimension_semantics=("parallel",)),
        cost_estimate=pl.CostEstimate(
            flops=flops, transcendentals=0, bytes_accessed=bytes_accessed),
    )(x2d, w1, b1, w2, b2, w3p, b3p)


def pair_mlp_encoder(x, params, *, tile_m=512):
    """Mirrors PairMLPEncoder.forward.  Returns (mu1, mu2), each (B, Z_DIM)."""
    w1, b1, w2, b2, w3, b3 = params

    # view(-1, 1, 28, 56) then split width into two 28x28 halves with a single
    # reshape/transpose; rows [0,B) are x1, rows [B,2B) are x2.
    x = x.reshape(-1, 28, 2, 28).astype(jnp.float32)
    b = x.shape[0]
    xcat = x.transpose(2, 0, 1, 3).reshape(2 * b, X_DIM)

    # bf16 activation/weight stream; f32 biases (added on the f32 accumulator);
    # zero-pad the last layer to 128 output lanes (zeros -> first 10 cols exact).
    xcat = xcat.astype(jnp.bfloat16)
    w3p = jnp.zeros((H_DIM2, Z_PAD), jnp.float32).at[:, :Z_DIM].set(w3).astype(jnp.bfloat16)
    b3p = jnp.zeros((1, Z_PAD), jnp.float32).at[:, :Z_DIM].set(b3)
    kparams = (w1.astype(jnp.bfloat16), b1.astype(jnp.float32),
               w2.astype(jnp.bfloat16), b2.astype(jnp.float32),
               w3p, b3p)

    # Pad rows to a tile multiple so every grid step is aligned; padded rows
    # are sliced away below.
    n = 2 * b
    tm = min(tile_m, _round_up(n, 256))
    n_pad = _round_up(n, tm)
    if n_pad != n:
        xcat = jnp.pad(xcat, ((0, n_pad - n), (0, 0)))

    out = _mlp_pallas(xcat, kparams, tile_m=tm)          # (n_pad, Z_PAD) f32
    out = out[:n, :Z_DIM]
    return out[:b], out[b:]


def init_params(key):
    """Deterministic synthetic parameters with the module's shapes (stored (in,out))."""
    ks = jax.random.split(key, 6)

    def lin(kw, kb, fan_in, fan_out):
        bound = 1.0 / np.sqrt(fan_in)
        w = jax.random.uniform(kw, (fan_in, fan_out), jnp.float32, -bound, bound)
        b = jax.random.uniform(kb, (1, fan_out), jnp.float32, -bound, bound)
        return w, b

    w1, b1 = lin(ks[0], ks[1], X_DIM, H_DIM1)
    w2, b2 = lin(ks[2], ks[3], H_DIM1, H_DIM2)
    w3, b3 = lin(ks[4], ks[5], H_DIM2, Z_DIM)
    return (w1, b1, w2, b2, w3, b3)


def _reference(x, params):
    """Pure-JAX (f32) reference of the original module's forward pass."""
    w1, b1, w2, b2, w3, b3 = params
    x = x.reshape(-1, 1, 28, 56).astype(jnp.float32)
    x1 = x[:, :, :, :28].reshape(-1, X_DIM)
    x2 = x[:, :, :, 28:].reshape(-1, X_DIM)

    def mlp(v):
        h = jnp.maximum(v @ w1 + b1, 0.0)
        h = jnp.maximum(h @ w2 + b2, 0.0)
        return h @ w3 + b3

    return mlp(x1), mlp(x2)


def _check(x, params, tol):
    mu1, mu2 = pair_mlp_encoder(x, params)
    mu1 = jax.block_until_ready(mu1)
    mu2 = jax.block_until_ready(mu2)
    ref1, ref2 = _reference(x, params)
    np.testing.assert_allclose(np.asarray(mu1), np.asarray(ref1), rtol=tol, atol=tol)
    np.testing.assert_allclose(np.asarray(mu2), np.asarray(ref2), rtol=tol, atol=tol)
    return mu1, mu2


if __name__ == "__main__":
    key = jax.random.PRNGKey(0)
    k_x, k_x2, k_p = jax.random.split(key, 3)
    params = init_params(k_p)

    # Small "paired MNIST" style batch: (B, 1, 28, 56).
    x_small = jax.random.normal(k_x, (2, 1, 28, 56), dtype=jnp.float32)
    mu1, mu2 = _check(x_small, params, tol=3e-2)   # bf16-stream tolerance
    assert mu1.shape == (2, Z_DIM) and mu2.shape == (2, Z_DIM)

    # Larger batch exercising the multi-step grid + remainder-row padding path.
    x_big = jax.random.normal(k_x2, (300, 1, 28, 56), dtype=jnp.float32)
    m1b, m2b = _check(x_big, params, tol=3e-2)
    assert m1b.shape == (300, Z_DIM) and m2b.shape == (300, Z_DIM)

    print("KERNEL_OK")
</pallas_src>

<mosaic_0001>
module attributes {stable_mosaic.version = 11 : i64} {
  func.func @_mlp_kernel(%arg0: i32, %arg1: memref<256x784xbf16, #tpu.memory_space<vmem>>, %arg2: memref<784x128xbf16, #tpu.memory_space<vmem>>, %arg3: memref<1x128xf32, #tpu.memory_space<vmem>>, %arg4: memref<128x128xbf16, #tpu.memory_space<vmem>>, %arg5: memref<1x128xf32, #tpu.memory_space<vmem>>, %arg6: memref<128x128xbf16, #tpu.memory_space<vmem>>, %arg7: memref<1x128xf32, #tpu.memory_space<vmem>>, %arg8: memref<256x128xf32, #tpu.memory_space<vmem>>) attributes {dimension_semantics = [#tpu.dimension_semantics<parallel>], iteration_bounds = array<i64: 1>, scalar_prefetch = 0 : i64, scratch_operands = 0 : i64, tpu.core_type = #tpu.core_type<tc>, window_params = [{transform_indices = @transform_0, window_bounds = array<i64: 256, 784>}, {pipeline_mode = #tpu.pipeline_mode<synchronous>, transform_indices = @transform_1, window_bounds = array<i64: 784, 128>}, {pipeline_mode = #tpu.pipeline_mode<synchronous>, transform_indices = @transform_2, window_bounds = array<i64: 1, 128>}, {pipeline_mode = #tpu.pipeline_mode<synchronous>, transform_indices = @transform_3, window_bounds = array<i64: 128, 128>}, {pipeline_mode = #tpu.pipeline_mode<synchronous>, transform_indices = @transform_4, window_bounds = array<i64: 1, 128>}, {pipeline_mode = #tpu.pipeline_mode<synchronous>, transform_indices = @transform_5, window_bounds = array<i64: 128, 128>}, {pipeline_mode = #tpu.pipeline_mode<synchronous>, transform_indices = @transform_6, window_bounds = array<i64: 1, 128>}, {transform_indices = @transform_7, window_bounds = array<i64: 256, 128>}]} {
    %c0 = arith.constant 0 : index
    %c0_0 = arith.constant 0 : index
    %0 = vector.load %arg1[%c0, %c0_0] : memref<256x784xbf16, #tpu.memory_space<vmem>>, vector<256x784xbf16>
    %c0_1 = arith.constant 0 : index
    %c0_2 = arith.constant 0 : index
    %1 = vector.load %arg2[%c0_1, %c0_2] : memref<784x128xbf16, #tpu.memory_space<vmem>>, vector<784x128xbf16>
    %cst = arith.constant dense<0.000000e+00> : vector<256x128xf32>
    %2 = tpu.matmul %0, %1, %cst {dimension_numbers = #tpu.dot_dimension_numbers<[1], [0], [0], [1], [0, 0, 1, 1], [], []>} : vector<256x784xbf16>, vector<784x128xbf16>, vector<256x128xf32> -> vector<256x128xf32>
    %c0_3 = arith.constant 0 : index
    %c0_4 = arith.constant 0 : index
    %3 = vector.load %arg3[%c0_3, %c0_4] : memref<1x128xf32, #tpu.memory_space<vmem>>, vector<1x128xf32>
    %4 = vector.broadcast %3 : vector<1x128xf32> to vector<256x128xf32>
    %5 = arith.addf %2, %4 : vector<256x128xf32>
    %cst_5 = arith.constant 0.000000e+00 : f32
    %6 = vector.broadcast %cst_5 : f32 to vector<256x128xf32>
    %7 = arith.maximumf %5, %6 : vector<256x128xf32>
    %8 = arith.truncf %7 : vector<256x128xf32> to vector<256x128xbf16>
    %c0_6 = arith.constant 0 : index
    %c0_7 = arith.constant 0 : index
    %9 = vector.load %arg4[%c0_6, %c0_7] : memref<128x128xbf16, #tpu.memory_space<vmem>>, vector<128x128xbf16>
    %cst_8 = arith.constant dense<0.000000e+00> : vector<256x128xf32>
    %10 = tpu.matmul %8, %9, %cst_8 {dimension_numbers = #tpu.dot_dimension_numbers<[1], [0], [0], [1], [0, 0, 1, 1], [], []>} : vector<256x128xbf16>, vector<128x128xbf16>, vector<256x128xf32> -> vector<256x128xf32>
    %c0_9 = arith.constant 0 : index
    %c0_10 = arith.constant 0 : index
    %11 = vector.load %arg5[%c0_9, %c0_10] : memref<1x128xf32, #tpu.memory_space<vmem>>, vector<1x128xf32>
    %12 = vector.broadcast %11 : vector<1x128xf32> to vector<256x128xf32>
    %13 = arith.addf %10, %12 : vector<256x128xf32>
    %cst_11 = arith.constant 0.000000e+00 : f32
    %14 = vector.broadcast %cst_11 : f32 to vector<256x128xf32>
    %15 = arith.maximumf %13, %14 : vector<256x128xf32>
    %16 = arith.truncf %15 : vector<256x128xf32> to vector<256x128xbf16>
    %c0_12 = arith.constant 0 : index
    %c0_13 = arith.constant 0 : index
    %17 = vector.load %arg6[%c0_12, %c0_13] : memref<128x128xbf16, #tpu.memory_space<vmem>>, vector<128x128xbf16>
    %cst_14 = arith.constant dense<0.000000e+00> : vector<256x128xf32>
    %18 = tpu.matmul %16, %17, %cst_14 {dimension_numbers = #tpu.dot_dimension_numbers<[1], [0], [0], [1], [0, 0, 1, 1], [], []>} : vector<256x128xbf16>, vector<128x128xbf16>, vector<256x128xf32> -> vector<256x128xf32>
    %c0_15 = arith.constant 0 : index
    %c0_16 = arith.constant 0 : index
    %19 = vector.load %arg7[%c0_15, %c0_16] : memref<1x128xf32, #tpu.memory_space<vmem>>, vector<1x128xf32>
    %20 = vector.broadcast %19 : vector<1x128xf32> to vector<256x128xf32>
    %21 = arith.addf %18, %20 : vector<256x128xf32>
    %c0_17 = arith.constant 0 : index
    %c0_18 = arith.constant 0 : index
    %22 = vector.load %arg8[%c0_17, %c0_18] : memref<256x128xf32, #tpu.memory_space<vmem>>, vector<256x128xf32>
    tpu.vector_store %arg8[%c0_17, %c0_18], %21 {strides = array<i32>} : memref<256x128xf32, #tpu.memory_space<vmem>>, vector<256x128xf32>,
    return
  }
  func.func @transform_0(%arg0: i32) -> (i32, i32) {
    %c0_i32 = arith.constant 0 : i32
    %c0_i32_0 = arith.constant 0 : i32
    return %arg0, %c0_i32 : i32, i32
  }
  func.func @transform_1(%arg0: i32) -> (i32, i32) {
    %c0_i32 = arith.constant 0 : i32
    %c0_i32_0 = arith.constant 0 : i32
    %c0_i32_1 = arith.constant 0 : i32
    return %c0_i32, %c0_i32_0 : i32, i32
  }
  func.func @transform_2(%arg0: i32) -> (i32, i32) {
    %c0_i32 = arith.constant 0 : i32
    %c0_i32_0 = arith.constant 0 : i32
    %c0_i32_1 = arith.constant 0 : i32
    return %c0_i32, %c0_i32_0 : i32, i32
  }
  func.func @transform_3(%arg0: i32) -> (i32, i32) {
    %c0_i32 = arith.constant 0 : i32
    %c0_i32_0 = arith.constant 0 : i32
    %c0_i32_1 = arith.constant 0 : i32
    return %c0_i32, %c0_i32_0 : i32, i32
  }
  func.func @transform_4(%arg0: i32) -> (i32, i32) {
    %c0_i32 = arith.constant 0 : i32
    %c0_i32_0 = arith.constant 0 : i32
    %c0_i32_1 = arith.constant 0 : i32
    return %c0_i32, %c0_i32_0 : i32, i32
  }
  func.func @transform_5(%arg0: i32) -> (i32, i32) {
    %c0_i32 = arith.constant 0 : i32
    %c0_i32_0 = arith.constant 0 : i32
    %c0_i32_1 = arith.constant 0 : i32
    return %c0_i32, %c0_i32_0 : i32, i32
  }
  func.func @transform_6(%arg0: i32) -> (i32, i32) {
    %c0_i32 = arith.constant 0 : i32
    %c0_i32_0 = arith.constant 0 : i32
    %c0_i32_1 = arith.constant 0 : i32
    return %c0_i32, %c0_i32_0 : i32, i32
  }
  func.func @transform_7(%arg0: i32) -> (i32, i32) {
    %c0_i32 = arith.constant 0 : i32
    %c0_i32_0 = arith.constant 0 : i32
    return %arg0, %c0_i32 : i32, i32
  }
}

</mosaic_0001>

<bundles_post_ra>
// kernel: tpu_custom_call.1
= control target key start
LH: loop header
LB: loop body
LE: loop exit
PB: predicated region body
PF: predicated region fallthrough
CT: control target
= control target key end

     0   :  { %s4487_s0 = inlined_call_operand.vmem [shape: bf16[256,784], index: 0, kind: input, shape index: {}]   ;;  %s4488_s1 = inlined_call_operand.vmem [shape: bf16[784,128], index: 1, kind: input, shape index: {}]   ;;  %s4489_s2 = inlined_call_operand.vmem [shape: f32[1,128], index: 2, kind: input, shape index: {}]   ;;  %s4490_s3 = inlined_call_operand.vmem [shape: bf16[128,128], index: 3, kind: input, shape index: {}]   ;;  %s4491_s4 = inlined_call_operand.vmem [shape: f32[1,128], index: 4, kind: input, shape index: {}]   ;;  %s4492_s5 = inlined_call_operand.vmem [shape: bf16[128,128], index: 5, kind: input, shape index: {}]   ;;  %s4493_s6 = inlined_call_operand.vmem [shape: f32[1,128], index: 6, kind: input, shape index: {}]   ;;  %s4494_s7 = inlined_call_operand.hbm [shape: f32[256,128], index: 7, kind: output, shape index: {}]  }
   0x1   :  { %v3087_v0 = vld [vmem:[%s4488_s1 + $0x38] sm:$0xff]  ;;  %v3086_v1 = vld [vmem:[%s4488_s1 + $0x30] sm:$0xff]  ;;  %v3085_v2 = vld [vmem:[%s4488_s1 + $0x28] sm:$0xff] }
   0x2   :  { %3145 = vmatpush.bf16.msra.mxu1 %v3087_v0  ;;  %3146 = vmatpush.bf16.msra.mxu2 %v3087_v0 }
   0x3   :  { %3147 = vmatpush.bf16.msra.mxu3 %v3087_v0  ;;  %1161 = vmatpush.bf16.msra.mxu0 %v3087_v0 }
   0x6   :  { %3148 = vmatpush.bf16.msra.mxu1 %v3086_v1  ;;  %3149 = vmatpush.bf16.msra.mxu2 %v3086_v1 }
   0x7   :  { %3150 = vmatpush.bf16.msra.mxu3 %v3086_v1  ;;  %1162 = vmatpush.bf16.msra.mxu0 %v3086_v1 }
   0x8   :  { %12 = vsyncpa [#allocation3], 0  ;;  %v3084_v3 = vld [vmem:[%s4488_s1 + $0x20] sm:$0xff]  ;;  %v3083_v4 = vld [vmem:[%s4488_s1 + $0x18] sm:$0xff]  ;;  %vm1112_vm0 = vcmask 130048   ;;  %s2232_s29 = sshll.u32 %s4494_s7, 4  ;;  %s2233_s29 = int_to_ptr.hbm [resolvable:$true] %s2232_s29 }
   0x9   :  { %v3082_v5 = vld [vmem:[%s4488_s1 + $0x10] sm:$0xff]  ;;  %v3081_v6 = vld [vmem:[%s4488_s1 + $0x8] sm:$0xff]  ;;  %v3080_v7 = vld [vmem:[%s4488_s1] sm:$0xff]  ;;  %s3202_s30 = smov 128   ;;  %s3203_s8 = smov 8  }
   0xa   :  { %3151 = vmatpush.bf16.msra.mxu1 %v3085_v2  ;;  %3152 = vmatpush.bf16.msra.mxu2 %v3085_v2  ;;  %v2358_v8 = vld [vmem:[%s4487_s0 + $0xe0] sm:$0xf]  ;;  %v2999_v9 = vld [vmem:[%s4487_s0 + $0xf8] sm:$0xf0]  ;;  %v3102_v21 = vld [vmem:[%s4488_s1 + $0xb0] sm:$0xff] }
   0xb   :  { %3153 = vmatpush.bf16.msra.mxu3 %v3085_v2  ;;  %1163 = vmatpush.bf16.msra.mxu0 %v3085_v2  ;;  %v2470_v10 = vld [vmem:[%s4487_s0 + $0x1c0] sm:$0xf]  ;;  %v3027_v11 = vld [vmem:[%s4487_s0 + $0x1d8] sm:$0xf0]  ;;  %v2359_v18 = vor.u32 %v2999_v9, %v2358_v8  ;;  %v3094_v23 = vld [vmem:[%s4488_s1 + $0x70] sm:$0xff] }
   0xc   :  { %v3103_v12 = vld [vmem:[%s4488_s1 + $0xb8] sm:$0xff]  ;;  %v2582_v13 = vld [vmem:[%s4487_s0 + $0x2a0] sm:$0xf]  ;;  %v2471_v19 = vor.u32 %v3027_v11, %v2470_v10  ;;  %v3101_v25 = vld [vmem:[%s4488_s1 + $0xa8] sm:$0xff] }
   0xd   :  { %v3055_v14 = vld [vmem:[%s4487_s0 + $0x2b8] sm:$0xf0]  ;;  %v2246_v16 = vld [vmem:[%s4487_s0] sm:$0xf]  ;;  %v3093_v26 = vld [vmem:[%s4488_s1 + $0x68] sm:$0xff] }
   0xe   :  { %3154 = vmatpush.bf16.msra.mxu1 %v3084_v3  ;;  %3155 = vmatpush.bf16.msra.mxu2 %v3084_v3  ;;  %v3095_v15 = vld [vmem:[%s4488_s1 + $0x78] sm:$0xff]  ;;  %v2583_v20 = vor.u32 %v3055_v14, %v2582_v13  ;;  %v3110_v27 = vld [vmem:[%s4488_s1 + $0xf0] sm:$0xff]  ;;  %v3100_v30 = vld [vmem:[%s4488_s1 + $0xa0] sm:$0xff] }
   0xf   :  { %3156 = vmatpush.bf16.msra.mxu3 %v3084_v3  ;;  %1164 = vmatpush.bf16.msra.mxu0 %v3084_v3  ;;  %v2971_v17 = vld [vmem:[%s4487_s0 + $0x18] sm:$0xf0]  ;;  %v3118_v29 = vld [vmem:[%s4488_s1 + $0x130] sm:$0xff]  ;;  %v3092_v31 = vld [vmem:[%s4488_s1 + $0x60] sm:$0xff] }
  0x10   :  { %v2247_v22 = vor.u32 %v2971_v17, %v2246_v16  ;;  %v3111_v24 = vld [vmem:[%s4488_s1 + $0xf8] sm:$0xff]  ;;  %v3109_v32 = vld [vmem:[%s4488_s1 + $0xe8] sm:$0xff]  ;;  %v3006_v34 = vld [vmem:[%s4487_s0 + $0x130] sm:$0xf0] }
  0x11   :  { %v3119_v28 = vld [vmem:[%s4488_s1 + $0x138] sm:$0xff]  ;;  %v3034_v36 = vld [vmem:[%s4487_s0 + $0x210] sm:$0xf0]  ;;  %v3108_v43 = vld [vmem:[%s4488_s1 + $0xe0] sm:$0xff] }
  0x12   :  { %3157 = vmatpush.bf16.msra.mxu1 %v3083_v4  ;;  %3158 = vmatpush.bf16.msra.mxu2 %v3083_v4  ;;  %v2386_v33 = vld [vmem:[%s4487_s0 + $0x118] sm:$0xf]  ;;  %v3062_v38 = vld [vmem:[%s4487_s0 + $0x2f0] sm:$0xf0]  ;;  %v3117_v51 = vld [vmem:[%s4488_s1 + $0x128] sm:$0xff] }
  0x13   :  { %3159 = vmatpush.bf16.msra.mxu3 %v3083_v4  ;;  %1165 = vmatpush.bf16.msra.mxu0 %v3083_v4  ;;  %v2498_v35 = vld [vmem:[%s4487_s0 + $0x1f8] sm:$0xf]  ;;  %v2978_v41 = vld [vmem:[%s4487_s0 + $0x50] sm:$0xf0]  ;;  %v2387_v44 = vor.u32 %v3006_v34, %v2386_v33  ;;  %v3097_v52 = vld [vmem:[%s4488_s1 + $0x88] sm:$0xff] }
  0x14   :  { %v2610_v37 = vld [vmem:[%s4487_s0 + $0x2d8] sm:$0xf]  ;;  %v2499_v45 = vor.u32 %v3034_v36, %v2498_v35  ;;  %v3098_v48 = vld [vmem:[%s4488_s1 + $0x90] sm:$0xff]  ;;  %v3089_v53 = vld [vmem:[%s4488_s1 + $0x48] sm:$0xff] }
  0x15   :  { %v2274_v39 = vld [vmem:[%s4487_s0 + $0x38] sm:$0xf]  ;;  %v2611_v46 = vor.u32 %v3062_v38, %v2610_v37  ;;  %v3090_v49 = vld [vmem:[%s4488_s1 + $0x50] sm:$0xff]  ;;  %v3116_v55 = vld [vmem:[%s4488_s1 + $0x120] sm:$0xff] }
  0x16   :  { %3160 = vmatpush.bf16.msra.mxu1 %v3082_v5  ;;  %3161 = vmatpush.bf16.msra.mxu2 %v3082_v5  ;;  %v3099_v40 = vld [vmem:[%s4488_s1 + $0x98] sm:$0xff]  ;;  %v2275_v47 = vor.u32 %v2978_v41, %v2274_v39  ;;  %v3106_v54 = vld [vmem:[%s4488_s1 + $0xd0] sm:$0xff]  ;;  %v3096_v56 = vld [vmem:[%s4488_s1 + $0x80] sm:$0xff] }
  0x17   :  { %3162 = vmatpush.bf16.msra.mxu3 %v3082_v5  ;;  %1166 = vmatpush.bf16.msra.mxu0 %v3082_v5  ;;  %v3091_v42 = vld [vmem:[%s4488_s1 + $0x58] sm:$0xff]  ;;  %v3105_v57 = vld [vmem:[%s4488_s1 + $0xc8] sm:$0xff]  ;;  %v3088_v58 = vld [vmem:[%s4488_s1 + $0x40] sm:$0xff] }
  0x18   :  { %v3107_v50 = vld [vmem:[%s4488_s1 + $0xd8] sm:$0xff]  ;;  %v2414_v59 = vld [vmem:[%s4487_s0 + $0x150] sm:$0xf]  ;;  %v3013_v61 = vld [vmem:[%s4487_s0 + $0x168] sm:$0xf0] }
  0x19   :  { %v3115_v60 = vld [vmem:[%s4488_s1 + $0x118] sm:$0xff]  ;;  %v2526_v62 = vld [vmem:[%s4487_s0 + $0x230] sm:$0xf]  ;;  %v3041_v63 = vld [vmem:[%s4487_s0 + $0x248] sm:$0xf0]  ;;  %v2415_v5 = vor.u32 %v3013_v61, %v2414_v59 }
  0x1a   :  { %3163 = vmatpush.bf16.msra.mxu1 %v3081_v6  ;;  %3164 = vmatpush.bf16.msra.mxu2 %v3081_v6  ;;  %v2638_v0 = vld [vmem:[%s4487_s0 + $0x310] sm:$0xf]  ;;  %v3069_v1 = vld [vmem:[%s4487_s0 + $0x328] sm:$0xf0]  ;;  %v3104_v4 = vld [vmem:[%s4488_s1 + $0xc0] sm:$0xff] }
  0x1b   :  { %3165 = vmatpush.bf16.msra.mxu3 %v3081_v6  ;;  %1167 = vmatpush.bf16.msra.mxu0 %v3081_v6  ;;  %v2302_v2 = vld [vmem:[%s4487_s0 + $0x70] sm:$0xf]  ;;  %v2985_v3 = vld [vmem:[%s4487_s0 + $0x88] sm:$0xf0]  ;;  %v2527_v6 = vor.u32 %v3041_v63, %v2526_v62  ;;  %v3128_v10 = vld [vmem:[%s4488_s1 + $0x180] sm:$0xff] }
  0x1c   :  { %v3114_v8 = vld [vmem:[%s4488_s1 + $0x110] sm:$0xff]  ;;  %v2303_v9 = vor.u32 %v2985_v3, %v2302_v2  ;;  %v3113_v11 = vld [vmem:[%s4488_s1 + $0x108] sm:$0xff]  ;;  %v3112_v13 = vld [vmem:[%s4488_s1 + $0x100] sm:$0xff] }
  0x1d   :  { %v2442_v14 = vld [vmem:[%s4487_s0 + $0x188] sm:$0xf]  ;;  %v3048_v17 = vld [vmem:[%s4487_s0 + $0x280] sm:$0xf0]  ;;  %v2973_v33 = vld [vmem:[%s4487_s0 + $0x28] sm:$0xf0] }
  0x1e   :  { %3166 = vmatpush.bf16.msra.mxu1 %v3080_v7  ;;  %3167 = vmatpush.bf16.msra.mxu2 %v3080_v7  ;;  %v2554_v16 = vld [vmem:[%s4487_s0 + $0x268] sm:$0xf]  ;;  %v3126_v38 = vld [vmem:[%s4488_s1 + $0x170] sm:$0xff]  ;;  %v2975_v39 = vld [vmem:[%s4487_s0 + $0x3c] sm:$0xf] }
  0x1f   :  { %3168 = vmatpush.bf16.msra.mxu3 %v3080_v7  ;;  %1168 = vmatpush.bf16.msra.mxu0 %v3080_v7  ;;  %v2639_v7 = vor.u32 %v3069_v1, %v2638_v0  ;;  %v2282_v41 = vld [vmem:[%s4487_s0 + $0x40] sm:$0xf]  ;;  %v3125_v63 = vld [vmem:[%s4488_s1 + $0x168] sm:$0xff]  ;;  %v2338_v2 = vld [vmem:[%s4487_s0 + $0xb0] sm:$0xf] }
  0x20   :  { %v2989_v0 = vld [vmem:[%s4487_s0 + $0xac] sm:$0xf]  ;;  %v2332_v1 = vld [vmem:[%s4487_s0 + $0xc4] sm:$0xf0] }
  0x21   :  { %1189 = vmatmul.bf16.vlgmr.msra.gmra.mxu1 %v2359_v18  ;;  %1209 = vmatmul.bf16.vlgmr.msra.gmra.mxu2 %v2471_v19  ;;  %v2666_v18 = vld [vmem:[%s4487_s0 + $0x348] sm:$0xf]  ;;  %v3076_v19 = vld [vmem:[%s4487_s0 + $0x360] sm:$0xf0]  ;;  %v2993_v3 = vld [vmem:[%s4487_s0 + $0xc8] sm:$0xf0] }
  0x22   :  { %1339 = vmatpush.bf16.msrb.mxu2 %v3103_v12  ;;  %1250 = vmatpush.bf16.msrb.mxu1 %v3095_v15  ;;  %v3127_v12 = vld [vmem:[%s4488_s1 + $0x178] sm:$0xff]  ;;  %v3020_v15 = vld [vmem:[%s4487_s0 + $0x1a0] sm:$0xf0] }
  0x23   :  { %1229 = vmatmul.bf16.vlgmr.msra.gmra.mxu3 %v2583_v20  ;;  %1169 = vmatmul.bf16.vlgmr.msra.gmra.mxu0 %v2247_v22  ;;  %v2330_v20 = vld [vmem:[%s4487_s0 + $0xa8] sm:$0xf]  ;;  %v2443_v22 = vor.u32 %v3020_v15, %v2442_v14  ;;  %v3000_v15 = vld [vmem:[%s4487_s0 + $0x100] sm:$0xf0] }
  0x24   :  { %1428 = vmatpush.bf16.msrb.mxu3 %v3111_v24  ;;  %1517 = vmatpush.bf16.msrb.mxu0 %v3119_v28  ;;  %v2667_v24 = vor.u32 %v3076_v19, %v2666_v18  ;;  %v2254_v28 = vld [vmem:[%s4487_s0 + $0x8] sm:$0xf]  ;;  %v2374_v19 = vld [vmem:[%s4487_s0 + $0xf0] sm:$0xf] }
  0x25   :  { %v2366_v14 = vld [vmem:[%s4487_s0 + $0xe8] sm:$0xf] }
  0x26   :  { %1340 = vmatpush.bf16.msrb.mxu2 %v3102_v21  ;;  %1251 = vmatpush.bf16.msrb.mxu1 %v3094_v23  ;;  %v2992_v21 = vld [vmem:[%s4487_s0 + $0xc0] sm:$0xf0]  ;;  %v2555_v23 = vor.u32 %v3048_v17, %v2554_v16  ;;  %v3583_v16 = vld [vmem:[%s4489_s2] ss:$0 sm:$0xff]  ;;  %v2997_v17 = vld [vmem:[%s4487_s0 + $0xec] sm:$0xf] }
  0x27   :  { %v2368_v18 = vld [vmem:[%s4487_s0 + $0x104] sm:$0xf0] }
  0x28   :  { %1429 = vmatpush.bf16.msrb.mxu3 %v3110_v27  ;;  %1518 = vmatpush.bf16.msrb.mxu0 %v3118_v29  ;;  %v2248_v27 = vld [vmem:[%s4487_s0 + $0x1c] sm:$0xf0]  ;;  %v2972_v29 = vld [vmem:[%s4487_s0 + $0x20] sm:$0xf0] }
  0x29   :  { %v2255_v35 = vor.u32 %v2972_v29, %v2254_v28 }
  0x2a   :  { %1341 = vmatpush.bf16.msrb.mxu2 %v3101_v25  ;;  %1252 = vmatpush.bf16.msrb.mxu1 %v3093_v26  ;;  %v2331_v25 = vor.u32 %v2992_v21, %v2330_v20  ;;  %v2968_v26 = vld [vmem:[%s4487_s0 + $0x4] sm:$0xf]  ;;  %v3001_v20 = vld [vmem:[%s4487_s0 + $0x108] sm:$0xf0] }
  0x2b   :  { %v2251_v34 = vor.u32 %v2968_v26, %v2248_v27  ;;  %v2375_v26 = vor.u32 %v3001_v20, %v2374_v19 }
  0x2c   :  { %1430 = vmatpush.bf16.msrb.mxu3 %v3109_v32  ;;  %1519 = vmatpush.bf16.msrb.mxu0 %v3117_v51  ;;  %v2262_v32 = vld [vmem:[%s4487_s0 + $0x10] sm:$0xf]  ;;  %v2982_v51 = vld [vmem:[%s4487_s0 + $0x74] sm:$0xf] }
  0x2d   :  { %v2263_v37 = vor.u32 %v2973_v33, %v2262_v32 }
  0x2e   :  { %1342 = vmatpush.bf16.msrb.mxu2 %v3100_v30  ;;  %1253 = vmatpush.bf16.msrb.mxu1 %v3092_v31  ;;  %v2969_v30 = vld [vmem:[%s4487_s0 + $0xc] sm:$0xf]  ;;  %v2256_v31 = vld [vmem:[%s4487_s0 + $0x24] sm:$0xf0] }
  0x2f   :  { %v2259_v36 = vor.u32 %v2969_v30, %v2256_v31  ;;  %v3124_v31 = vld [vmem:[%s4488_s1 + $0x160] sm:$0xff] }
  0x30   :  { %1431 = vmatpush.bf16.msrb.mxu3 %v3108_v43  ;;  %1520 = vmatpush.bf16.msrb.mxu0 %v3116_v55  ;;  %v2976_v43 = vld [vmem:[%s4487_s0 + $0x44] sm:$0xf]  ;;  %v2983_v55 = vld [vmem:[%s4487_s0 + $0x7c] sm:$0xf] }
  0x31   :  { %1194 = vmatmul.bf16.gmra.mxu1 %v2387_v44  ;;  %1214 = vmatmul.bf16.gmra.mxu2 %v2499_v45  ;;  %v2284_v44 = vld [vmem:[%s4487_s0 + $0x5c] sm:$0xf0]  ;;  %v2290_v45 = vld [vmem:[%s4487_s0 + $0x48] sm:$0xf] }
  0x32   :  { %1343 = vmatpush.bf16.msrb.mxu2 %v3099_v40  ;;  %1254 = vmatpush.bf16.msrb.mxu1 %v3091_v42  ;;  %v2276_v40 = vld [vmem:[%s4487_s0 + $0x54] sm:$0xf0]  ;;  %v2979_v42 = vld [vmem:[%s4487_s0 + $0x58] sm:$0xf0] }
  0x33   :  { %1234 = vmatmul.bf16.gmra.mxu3 %v2611_v46  ;;  %1174 = vmatmul.bf16.gmra.mxu0 %v2275_v47  ;;  %v2980_v46 = vld [vmem:[%s4487_s0 + $0x60] sm:$0xf0]  ;;  %v2279_v47 = vor.u32 %v2975_v39, %v2276_v40  ;;  %v3007_v39 = vld [vmem:[%s4487_s0 + $0x138] sm:$0xf0] }
  0x34   :  { %1432 = vmatpush.bf16.msrb.mxu3 %v3107_v50  ;;  %1521 = vmatpush.bf16.msrb.mxu0 %v3115_v60  ;;  %v2291_v50 = vor.u32 %v2980_v46, %v2290_v45  ;;  %v3004_v40 = vld [vmem:[%s4487_s0 + $0x124] sm:$0xf] }
  0x36   :  { %1344 = vmatpush.bf16.msrb.mxu2 %v3098_v48  ;;  %1255 = vmatpush.bf16.msrb.mxu1 %v3090_v49  ;;  %v2283_v48 = vor.u32 %v2979_v42, %v2282_v41  ;;  %v2287_v49 = vor.u32 %v2976_v43, %v2284_v44  ;;  %v2396_v41 = vld [vmem:[%s4487_s0 + $0x13c] sm:$0xf0]  ;;  %v2402_v43 = vld [vmem:[%s4487_s0 + $0x128] sm:$0xf]  ;;  %v3008_v44 = vld [vmem:[%s4487_s0 + $0x140] sm:$0xf0] }
  0x38   :  { %1433 = vmatpush.bf16.msrb.mxu3 %v3106_v54  ;;  %1522 = vmatpush.bf16.msrb.mxu0 %v3114_v8  ;;  %v2986_v54 = vld [vmem:[%s4487_s0 + $0x90] sm:$0xf0]  ;;  %v2335_v8 = vor.u32 %v2989_v0, %v2332_v1  ;;  %v2422_v0 = vld [vmem:[%s4487_s0 + $0x158] sm:$0xf] }
  0x39   :  { %v3014_v1 = vld [vmem:[%s4487_s0 + $0x170] sm:$0xf0] }
  0x3a   :  { %1345 = vmatpush.bf16.msrb.mxu2 %v3097_v52  ;;  %1256 = vmatpush.bf16.msrb.mxu1 %v3089_v53  ;;  %v2304_v52 = vld [vmem:[%s4487_s0 + $0x8c] sm:$0xf0]  ;;  %v2310_v53 = vld [vmem:[%s4487_s0 + $0x78] sm:$0xf] }
  0x3b   :  { %v2307_v59 = vor.u32 %v2982_v51, %v2304_v52  ;;  %v2311_v60 = vor.u32 %v2986_v54, %v2310_v53  ;;  %v2399_v51 = vor.u32 %v3004_v40, %v2396_v41  ;;  %v2403_v53 = vor.u32 %v3008_v44, %v2402_v43  ;;  %v3022_v40 = vld [vmem:[%s4487_s0 + $0x1b0] sm:$0xf0] }
  0x3c   :  { %1434 = vmatpush.bf16.msrb.mxu3 %v3105_v57  ;;  %1523 = vmatpush.bf16.msrb.mxu0 %v3113_v11  ;;  %v2318_v57 = vld [vmem:[%s4487_s0 + $0x80] sm:$0xf] }
  0x3e   :  { %1346 = vmatpush.bf16.msrb.mxu2 %v3096_v56  ;;  %1257 = vmatpush.bf16.msrb.mxu1 %v3088_v58  ;;  %v2312_v56 = vld [vmem:[%s4487_s0 + $0x94] sm:$0xf0]  ;;  %v2987_v58 = vld [vmem:[%s4487_s0 + $0x98] sm:$0xf0] }
  0x3f   :  { %v2315_v61 = vor.u32 %v2983_v55, %v2312_v56  ;;  %v2319_v62 = vor.u32 %v2987_v58, %v2318_v57 }
  0x40   :  { %1435 = vmatpush.bf16.msrb.mxu3 %v3104_v4  ;;  %1524 = vmatpush.bf16.msrb.mxu0 %v3112_v13  ;;  %v2990_v4 = vld [vmem:[%s4487_s0 + $0xb4] sm:$0xf]  ;;  %v2360_v13 = vld [vmem:[%s4487_s0 + $0xfc] sm:$0xf0] }
  0x41   :  { %1199 = vmatmul.bf16.gmra.mxu1 %v2415_v5  ;;  %1219 = vmatmul.bf16.gmra.mxu2 %v2527_v6  ;;  %v2340_v5 = vld [vmem:[%s4487_s0 + $0xcc] sm:$0xf0]  ;;  %v2346_v6 = vld [vmem:[%s4487_s0 + $0xb8] sm:$0xf] }
  0x42   :  { %1702 = vmatpush.bf16.msra.mxu2 %v3128_v10  ;;  %1606 = vmatpush.bf16.msra.mxu1 %v3127_v12  ;;  %v2343_v10 = vor.u32 %v2990_v4, %v2340_v5  ;;  %v2996_v12 = vld [vmem:[%s4487_s0 + $0xe4] sm:$0xf]  ;;  %v2430_v5 = vld [vmem:[%s4487_s0 + $0x160] sm:$0xf] }
  0x43   :  { %1239 = vmatmul.bf16.gmra.mxu3 %v2639_v7  ;;  %1179 = vmatmul.bf16.gmra.mxu0 %v2303_v9  ;;  %v2994_v7 = vld [vmem:[%s4487_s0 + $0xd0] sm:$0xf0]  ;;  %v2339_v9 = vor.u32 %v2993_v3, %v2338_v2  ;;  %v2363_v21 = vor.u32 %v2996_v12, %v2360_v13  ;;  %v3011_v2 = vld [vmem:[%s4487_s0 + $0x15c] sm:$0xf]  ;;  %v2424_v3 = vld [vmem:[%s4487_s0 + $0x174] sm:$0xf0] }
  0x44   :  { %v2347_v11 = vor.u32 %v2994_v7, %v2346_v6  ;;  %v3015_v6 = vld [vmem:[%s4487_s0 + $0x178] sm:$0xf0]  ;;  %v2427_v13 = vor.u32 %v3011_v2, %v2424_v3  ;;  %v3024_v3 = vld [vmem:[%s4487_s0 + $0x1c4] sm:$0xf] }
  0x46   :  { %1607 = vmatpush.bf16.msra.mxu1 %v3126_v38  ;;  %v2394_v38 = vld [vmem:[%s4487_s0 + $0x120] sm:$0xf] }
  0x4a   :  { %1608 = vmatpush.bf16.msra.mxu1 %v3125_v63  ;;  %v2416_v63 = vld [vmem:[%s4487_s0 + $0x16c] sm:$0xf0] }
  0x4e   :  { %1609 = vmatpush.bf16.msra.mxu1 %v3124_v31  ;;  %v2450_v31 = vld [vmem:[%s4487_s0 + $0x190] sm:$0xf] }
  0x51   :  { %1204 = vmatmul.bf16.gmra.mxu1 %v2443_v22  ;;  %1224 = vmatmul.bf16.gmra.mxu2 %v2555_v23  ;;  %v2367_v22 = vor.u32 %v3000_v15, %v2366_v14  ;;  %v2431_v15 = vor.u32 %v3015_v6, %v2430_v5  ;;  %v2478_v5 = vld [vmem:[%s4487_s0 + $0x1c8] sm:$0xf]  ;;  %v3028_v6 = vld [vmem:[%s4487_s0 + $0x1e0] sm:$0xf0] }
  0x53   :  { %1244 = vmatmul.bf16.gmra.mxu3 %v2667_v24  ;;  %1184 = vmatmul.bf16.gmra.mxu0 %v2331_v25  ;;  %v2371_v24 = vor.u32 %v2997_v17, %v2368_v18 }
  0x61   :  { %1258 = vmatmul.bf16.vlgmr.msrb.gmra.mxu1 %v2251_v34  ;;  %1347 = vmatmul.bf16.vlgmr.msrb.gmra.mxu2 %v2255_v35 }
  0x63   :  { %1436 = vmatmul.bf16.vlgmr.msrb.gmra.mxu3 %v2259_v36  ;;  %1525 = vmatmul.bf16.vlgmr.msrb.gmra.mxu0 %v2263_v37  ;;  %v3003_v36 = vld [vmem:[%s4487_s0 + $0x11c] sm:$0xf]  ;;  %v2388_v37 = vld [vmem:[%s4487_s0 + $0x134] sm:$0xf0] }
  0x71   :  { %1263 = vmatmul.bf16.gmra.mxu1 %v2279_v47  ;;  %1352 = vmatmul.bf16.gmra.mxu2 %v2283_v48  ;;  %v2391_v47 = vor.u32 %v3003_v36, %v2388_v37  ;;  %v2395_v48 = vor.u32 %v3007_v39, %v2394_v38  ;;  %v3018_v36 = vld [vmem:[%s4487_s0 + $0x194] sm:$0xf]  ;;  %v2452_v37 = vld [vmem:[%s4487_s0 + $0x1ac] sm:$0xf0]  ;;  %v2458_v39 = vld [vmem:[%s4487_s0 + $0x198] sm:$0xf] }
  0x73   :  { %1441 = vmatmul.bf16.gmra.mxu3 %v2287_v49  ;;  %1530 = vmatmul.bf16.gmra.mxu0 %v2291_v50 }
  0x81   :  { %1268 = vmatmul.bf16.gmra.mxu1 %v2307_v59  ;;  %1357 = vmatmul.bf16.gmra.mxu2 %v2311_v60 }
  0x83   :  { %1446 = vmatmul.bf16.gmra.mxu3 %v2315_v61  ;;  %1535 = vmatmul.bf16.gmra.mxu0 %v2319_v62  ;;  %v3010_v62 = vld [vmem:[%s4487_s0 + $0x154] sm:$0xf] }
  0x91   :  { %1273 = vmatmul.bf16.gmra.mxu1 %v2335_v8  ;;  %1362 = vmatmul.bf16.gmra.mxu2 %v2339_v9  ;;  %v2419_v9 = vor.u32 %v3010_v62, %v2416_v63 }
  0x93   :  { %1451 = vmatmul.bf16.gmra.mxu3 %v2343_v10  ;;  %1540 = vmatmul.bf16.gmra.mxu0 %v2347_v11  ;;  %v2423_v10 = vor.u32 %v3014_v1, %v2422_v0 }
  0x9e   :  { %v1190_v23 = vpop.f32.mrf.mxu1 }
  0x9f   :  { %v3598_v25 = vadd.f32 %v3583_v16, %v1190_v23 }
  0xa0   :  { %v3600_v27 = vpop.f32.mrf.mxu0 }
  0xa1   :  { %1278 = vmatmul.bf16.gmra.mxu1 %v2363_v21  ;;  %1367 = vmatmul.bf16.gmra.mxu2 %v2367_v22  ;;  %v3123_v21 = vld [vmem:[%s4488_s1 + $0x158] sm:$0xff] }
  0xa2   :  { %1610 = vmatpush.bf16.msra.mxu1 %v3123_v21  ;;  %v2479_v21 = vor.u32 %v3028_v6, %v2478_v5  ;;  %v2514_v6 = vld [vmem:[%s4487_s0 + $0x208] sm:$0xf] }
  0xa3   :  { %1456 = vmatmul.bf16.gmra.mxu3 %v2371_v24  ;;  %1545 = vmatmul.bf16.gmra.mxu0 %v2375_v26 }
  0xa4   :  { %v1210_v28 = vpop.f32.mrf.mxu2 }
  0xa5   :  { %v3603_v29 = vadd.f32 %v3583_v16, %v1210_v28  ;;  %v3017_v28 = vld [vmem:[%s4487_s0 + $0x18c] sm:$0xf] }
  0xa6   :  { %v1230_v30 = vpop.f32.mrf.mxu3  ;;  %v1192_v32 = vpop.f32.mrf.mxu1 }
  0xa7   :  { %v3609_v33 = vadd.f32 %v3583_v16, %v1230_v30  ;;  %v3612_v34 = vadd.f32 %v3583_v16, %v1192_v32  ;;  %v2444_v30 = vld [vmem:[%s4487_s0 + $0x1a4] sm:$0xf0]  ;;  %v3021_v32 = vld [vmem:[%s4487_s0 + $0x1a8] sm:$0xf0] }
  0xa8   :  { %v3614_v35 = vpop.f32.mrf.mxu0  ;;  %v2447_v43 = vor.u32 %v3017_v28, %v2444_v30  ;;  %v2451_v44 = vor.u32 %v3021_v32, %v2450_v31 }
  0xac   :  { %v1212_v42 = vpop.f32.mrf.mxu2 }
  0xad   :  { %v3641_v45 = vadd.f32 %v3583_v16, %v1212_v42 }
  0xae   :  { %v1232_v46 = vpop.f32.mrf.mxu3  ;;  %v1195_v49 = vpop.f32.mrf.mxu1 }
  0xaf   :  { %v3644_v50 = vadd.f32 %v3583_v16, %v1232_v46  ;;  %v3647_v52 = vadd.f32 %v3583_v16, %v1195_v49 }
  0xb0   :  { %v3649_v54 = vpop.f32.mrf.mxu0 }
  0xb1   :  { %1283 = vmatmul.bf16.gmra.mxu1 %v2391_v47  ;;  %1372 = vmatmul.bf16.gmra.mxu2 %v2395_v48  ;;  %v2455_v48 = vor.u32 %v3018_v36, %v2452_v37  ;;  %v1173_v37 = vadd.f32 %v3583_v16, %v3614_v35  ;;  %v2500_v35 = vld [vmem:[%s4487_s0 + $0x214] sm:$0xf0] }
  0xb3   :  { %1461 = vmatmul.bf16.gmra.mxu3 %v2399_v51  ;;  %1550 = vmatmul.bf16.gmra.mxu0 %v2403_v53  ;;  %v2459_v51 = vor.u32 %v3022_v40, %v2458_v39 }
  0xb4   :  { %v1215_v55 = vpop.f32.mrf.mxu2 }
  0xb5   :  { %v3652_v56 = vadd.f32 %v3583_v16, %v1215_v55  ;;  %v3136_v55 = vld [vmem:[%s4490_s3 + $0x38] sm:$0xff] }
  0xb6   :  { %v1235_v57 = vpop.f32.mrf.mxu3  ;;  %v1197_v58 = vpop.f32.mrf.mxu1  ;;  %1900 = vmatpush.bf16.msra.mxu3 %v3136_v55  ;;  %v3031_v55 = vld [vmem:[%s4487_s0 + $0x1fc] sm:$0xf] }
  0xb7   :  { %v3655_v59 = vadd.f32 %v3583_v16, %v1235_v57  ;;  %v3658_v60 = vadd.f32 %v3583_v16, %v1197_v58 }
  0xb8   :  { %v3660_v61 = vpop.f32.mrf.mxu0 }
  0xbc   :  { %v1217_v4 = vpop.f32.mrf.mxu2 }
  0xbd   :  { %v3687_v7 = vadd.f32 %v3583_v16, %v1217_v4  ;;  %v2472_v4 = vld [vmem:[%s4487_s0 + $0x1dc] sm:$0xf0] }
  0xbe   :  { %v1237_v8 = vpop.f32.mrf.mxu3  ;;  %v1200_v11 = vpop.f32.mrf.mxu1 }
  0xbf   :  { %v3690_v12 = vadd.f32 %v3583_v16, %v1237_v8  ;;  %v3693_v14 = vadd.f32 %v3583_v16, %v1200_v11  ;;  %v1171_v8 = vadd.f32 %v3583_v16, %v3600_v27 }
  0xc0   :  { %v3695_v17 = vpop.f32.mrf.mxu0 }
  0xc1   :  { %1288 = vmatmul.bf16.gmra.mxu1 %v2419_v9  ;;  %1377 = vmatmul.bf16.gmra.mxu2 %v2423_v10  ;;  %v3025_v9 = vld [vmem:[%s4487_s0 + $0x1cc] sm:$0xf]  ;;  %v2480_v10 = vld [vmem:[%s4487_s0 + $0x1e4] sm:$0xf0] }
  0xc2   :  { %v2483_v30 = vor.u32 %v3025_v9, %v2480_v10 }
  0xc3   :  { %1466 = vmatmul.bf16.gmra.mxu3 %v2427_v13  ;;  %1555 = vmatmul.bf16.gmra.mxu0 %v2431_v15  ;;  %v2486_v13 = vld [vmem:[%s4487_s0 + $0x1d0] sm:$0xf]  ;;  %v3029_v15 = vld [vmem:[%s4487_s0 + $0x1e8] sm:$0xf0] }
  0xc4   :  { %v1220_v18 = vpop.f32.mrf.mxu2  ;;  %v2487_v32 = vor.u32 %v3029_v15, %v2486_v13 }
  0xc5   :  { %v3698_v19 = vadd.f32 %v3583_v16, %v1220_v18 }
  0xc6   :  { %v1240_v20 = vpop.f32.mrf.mxu3  ;;  %v1202_v22 = vpop.f32.mrf.mxu1 }
  0xc7   :  { %v3704_v23 = vadd.f32 %v3583_v16, %v1240_v20  ;;  %v3707_v24 = vadd.f32 %v3583_v16, %v1202_v22  ;;  %v2475_v20 = vor.u32 %v3024_v3, %v2472_v4  ;;  %v3032_v3 = vld [vmem:[%s4487_s0 + $0x204] sm:$0xf]  ;;  %v2508_v4 = vld [vmem:[%s4487_s0 + $0x21c] sm:$0xf0] }
  0xc8   :  { %v3709_v26 = vpop.f32.mrf.mxu0  ;;  %v2511_v15 = vor.u32 %v3032_v3, %v2508_v4  ;;  %v2542_v3 = vld [vmem:[%s4487_s0 + $0x240] sm:$0xf]  ;;  %v3043_v4 = vld [vmem:[%s4487_s0 + $0x258] sm:$0xf0] }
  0xcc   :  { %v1222_v38 = vpop.f32.mrf.mxu2 }
  0xcd   :  { %v3736_v41 = vadd.f32 %v3583_v16, %v1222_v38 }
  0xce   :  { %v1242_v42 = vpop.f32.mrf.mxu3  ;;  %v1205_v46 = vpop.f32.mrf.mxu1 }
  0xcf   :  { %v3739_v47 = vadd.f32 %v3583_v16, %v1242_v42  ;;  %v3742_v49 = vadd.f32 %v3583_v16, %v1205_v46  ;;  %v3122_v42 = vld [vmem:[%s4488_s1 + $0x150] sm:$0xff] }
  0xd0   :  { %v3744_v53 = vpop.f32.mrf.mxu0  ;;  %1611 = vmatpush.bf16.msra.mxu1 %v3122_v42 }
  0xd1   :  { %1293 = vmatmul.bf16.gmra.mxu1 %v2447_v43  ;;  %1382 = vmatmul.bf16.gmra.mxu2 %v2451_v44 }
  0xd3   :  { %1471 = vmatmul.bf16.gmra.mxu3 %v2455_v48  ;;  %1560 = vmatmul.bf16.gmra.mxu0 %v2459_v51 }
  0xd4   :  { %v1225_v57 = vpop.f32.mrf.mxu2 }
  0xd5   :  { %v3750_v58 = vadd.f32 %v3583_v16, %v1225_v57  ;;  %v2506_v57 = vld [vmem:[%s4487_s0 + $0x200] sm:$0xf] }
  0xd6   :  { %v1245_v62 = vpop.f32.mrf.mxu3  ;;  %v1207_v63 = vpop.f32.mrf.mxu1 }
  0xd7   :  { %v3753_v0 = vadd.f32 %v3583_v16, %v1245_v62  ;;  %v3756_v1 = vadd.f32 %v3583_v16, %v1207_v63  ;;  %v3035_v62 = vld [vmem:[%s4487_s0 + $0x218] sm:$0xf0]  ;;  %v1176_v63 = vadd.f32 %v3583_v16, %v3649_v54  ;;  %v2503_v54 = vor.u32 %v3031_v55, %v2500_v35  ;;  %v3042_v55 = vld [vmem:[%s4487_s0 + $0x250] sm:$0xf0] }
  0xd8   :  { %v3758_v2 = vpop.f32.mrf.mxu0  ;;  %v1181_v35 = vadd.f32 %v3583_v16, %v3695_v17 }
  0xdc   :  { %v1227_v11 = vpop.f32.mrf.mxu2 }
  0xdd   :  { %v3787_v18 = vadd.f32 %v3583_v16, %v1227_v11  ;;  %v2507_v11 = vor.u32 %v3035_v62, %v2506_v57  ;;  %v3039_v57 = vld [vmem:[%s4487_s0 + $0x23c] sm:$0xf]  ;;  %v2536_v62 = vld [vmem:[%s4487_s0 + $0x254] sm:$0xf0] }
  0xde   :  { %v1247_v27 = vpop.f32.mrf.mxu3  ;;  %v1259_v28 = vpop.f32.mrf.mxu1 }
  0xdf   :  { %v3790_v22 = vadd.f32 %v3583_v16, %v1247_v27  ;;  %v1260_v31 = vadd.f32 %v1259_v28, %v1171_v8  ;;  %v3036_v8 = vld [vmem:[%s4487_s0 + $0x220] sm:$0xf0] }
  0xe0   :  { %v1526_v36 = vpop.f32.mrf.mxu0 }
  0xe1   :  { %1298 = vmatmul.bf16.gmra.mxu1 %v2475_v20  ;;  %1387 = vmatmul.bf16.gmra.mxu2 %v2479_v21  ;;  %v2515_v21 = vor.u32 %v3036_v8, %v2514_v6 }
  0xe3   :  { %1476 = vmatmul.bf16.gmra.mxu3 %v2483_v30  ;;  %1565 = vmatmul.bf16.gmra.mxu0 %v2487_v32  ;;  %v1178_v32 = vadd.f32 %v3583_v16, %v3660_v61  ;;  %v2534_v61 = vld [vmem:[%s4487_s0 + $0x238] sm:$0xf] }
  0xe4   :  { %v1348_v38 = vpop.f32.mrf.mxu2  ;;  %v2535_v8 = vor.u32 %v3042_v55, %v2534_v61  ;;  %v3046_v61 = vld [vmem:[%s4487_s0 + $0x274] sm:$0xf]  ;;  %v2564_v55 = vld [vmem:[%s4487_s0 + $0x28c] sm:$0xf0] }
  0xe5   :  { %v1349_v39 = vadd.f32 %v1348_v38, %v1260_v31  ;;  %v3135_v31 = vld [vmem:[%s4490_s3 + $0x30] sm:$0xff] }
  0xe6   :  { %v1437_v40 = vpop.f32.mrf.mxu3  ;;  %v1261_v43 = vpop.f32.mrf.mxu1  ;;  %1901 = vmatpush.bf16.msra.mxu3 %v3135_v31 }
  0xe7   :  { %v1262_v44 = vadd.f32 %v1261_v43, %v1173_v37  ;;  %v1438_v46 = vadd.f32 %v1437_v40, %v1349_v39 }
  0xe8   :  { %v1528_v48 = vpop.f32.mrf.mxu0 }
  0xe9   :  { %v3797_v51 = vadd.f32 %v1526_v36, %v1438_v46  ;;  %v3038_v46 = vld [vmem:[%s4487_s0 + $0x234] sm:$0xf] }
  0xec   :  { %v1350_v5 = vpop.f32.mrf.mxu2 }
  0xed   :  { %v1351_v9 = vadd.f32 %v1350_v5, %v1262_v44 }
  0xee   :  { %v1439_v10 = vpop.f32.mrf.mxu3  ;;  %v1264_v13 = vpop.f32.mrf.mxu1 }
  0xef   :  { %v1265_v27 = vadd.f32 %v1264_v13, %v1176_v63  ;;  %v1440_v20 = vadd.f32 %v1439_v10, %v1351_v9  ;;  %v2539_v10 = vor.u32 %v3039_v57, %v2536_v62  ;;  %v2543_v13 = vor.u32 %v3043_v4, %v2542_v3  ;;  %v2570_v57 = vld [vmem:[%s4487_s0 + $0x278] sm:$0xf]  ;;  %v3050_v62 = vld [vmem:[%s4487_s0 + $0x290] sm:$0xf0] }
  0xf0   :  { %v1531_v28 = vpop.f32.mrf.mxu0 }
  0xf1   :  { %v3825_v30 = vadd.f32 %v1528_v48, %v1440_v20  ;;  %1303 = vmatmul.bf16.gmra.mxu1 %v2503_v54  ;;  %1392 = vmatmul.bf16.gmra.mxu2 %v2507_v11  ;;  %v2528_v48 = vld [vmem:[%s4487_s0 + $0x24c] sm:$0xf0]  ;;  %v1183_v20 = vadd.f32 %v3583_v16, %v3709_v26  ;;  %v2556_v26 = vld [vmem:[%s4487_s0 + $0x284] sm:$0xf0] }
  0xf2   :  { %v2531_v17 = vor.u32 %v3038_v46, %v2528_v48  ;;  %v3049_v46 = vld [vmem:[%s4487_s0 + $0x288] sm:$0xf0]  ;;  %v1186_v48 = vadd.f32 %v3583_v16, %v3744_v53 }
  0xf3   :  { %1481 = vmatmul.bf16.gmra.mxu3 %v2511_v15  ;;  %1570 = vmatmul.bf16.gmra.mxu0 %v2515_v21 }
  0xf4   :  { %v1353_v36 = vpop.f32.mrf.mxu2 }
  0xf5   :  { %v1354_v37 = vadd.f32 %v1353_v36, %v1265_v27 }
  0xf6   :  { %v1442_v38 = vpop.f32.mrf.mxu3  ;;  %v1266_v39 = vpop.f32.mrf.mxu1 }
  0xf7   :  { %v1267_v40 = vadd.f32 %v1266_v39, %v1178_v32  ;;  %v1443_v42 = vadd.f32 %v1442_v38, %v1354_v37  ;;  %v3121_v32 = vld [vmem:[%s4488_s1 + $0x148] sm:$0xff] }
  0xf8   :  { %v1533_v43 = vpop.f32.mrf.mxu0  ;;  %1612 = vmatpush.bf16.msra.mxu1 %v3121_v32 }
  0xf9   :  { %v3832_v44 = vadd.f32 %v1531_v28, %v1443_v42 }
  0xfc   :  { %v1355_v63 = vpop.f32.mrf.mxu2 }
  0xfd   :  { %v1356_v5 = vadd.f32 %v1355_v63, %v1267_v40  ;;  %v3045_v40 = vld [vmem:[%s4487_s0 + $0x26c] sm:$0xf] }
  0xfe   :  { %v1444_v6 = vpop.f32.mrf.mxu3  ;;  %v1269_v9 = vpop.f32.mrf.mxu1  ;;  %v2559_v53 = vor.u32 %v3045_v40, %v2556_v26  ;;  %v3053_v40 = vld [vmem:[%s4487_s0 + $0x2ac] sm:$0xf] }
  0xff   :  { %v1270_v54 = vadd.f32 %v1269_v9, %v1181_v35  ;;  %v1445_v11 = vadd.f32 %v1444_v6, %v1356_v5  ;;  %v2567_v6 = vor.u32 %v3046_v61, %v2564_v55  ;;  %v2571_v9 = vor.u32 %v3050_v62, %v2570_v57 }
 0x100   :  { %v1536_v15 = vpop.f32.mrf.mxu0 }
 0x101   :  { %v3860_v27 = vadd.f32 %v1533_v43, %v1445_v11  ;;  %1308 = vmatmul.bf16.gmra.mxu1 %v2531_v17  ;;  %1397 = vmatmul.bf16.gmra.mxu2 %v2535_v8  ;;  %v2562_v43 = vld [vmem:[%s4487_s0 + $0x270] sm:$0xf]  ;;  %v1188_v11 = vadd.f32 %v3583_v16, %v3758_v2  ;;  %v2590_v16 = vld [vmem:[%s4487_s0 + $0x2a8] sm:$0xf]  ;;  %v3056_v2 = vld [vmem:[%s4487_s0 + $0x2c0] sm:$0xf0] }
 0x102   :  { %v2563_v4 = vor.u32 %v3049_v46, %v2562_v43  ;;  %v2598_v43 = vld [vmem:[%s4487_s0 + $0x2b0] sm:$0xf]  ;;  %v3057_v46 = vld [vmem:[%s4487_s0 + $0x2c8] sm:$0xf0] }
 0x103   :  { %1486 = vmatmul.bf16.gmra.mxu3 %v2539_v10  ;;  %1575 = vmatmul.bf16.gmra.mxu0 %v2543_v13 }
 0x104   :  { %v1358_v21 = vpop.f32.mrf.mxu2 }
 0x105   :  { %v1359_v28 = vadd.f32 %v1358_v21, %v1270_v54  ;;  %v3134_v54 = vld [vmem:[%s4490_s3 + $0x28] sm:$0xff] }
 0x106   :  { %v1447_v31 = vpop.f32.mrf.mxu3  ;;  %v1271_v36 = vpop.f32.mrf.mxu1  ;;  %1902 = vmatpush.bf16.msra.mxu3 %v3134_v54 }
 0x107   :  { %v1272_v37 = vadd.f32 %v1271_v36, %v1183_v20  ;;  %v1448_v38 = vadd.f32 %v1447_v31, %v1359_v28 }
 0x108   :  { %v1538_v42 = vpop.f32.mrf.mxu0 }
 0x109   :  { %v3867_v39 = vadd.f32 %v1536_v15, %v1448_v38  ;;  %v2584_v38 = vld [vmem:[%s4487_s0 + $0x2bc] sm:$0xf0] }
 0x10c   :  { %v1360_v35 = vpop.f32.mrf.mxu2 }
 0x10d   :  { %v1361_v63 = vadd.f32 %v1360_v35, %v1272_v37  ;;  %v3052_v37 = vld [vmem:[%s4487_s0 + $0x2a4] sm:$0xf]  ;;  %v2591_v35 = vor.u32 %v3056_v2, %v2590_v16 }
 0x10e   :  { %v1449_v3 = vpop.f32.mrf.mxu3  ;;  %v1274_v5 = vpop.f32.mrf.mxu1  ;;  %v2587_v55 = vor.u32 %v3052_v37, %v2584_v38  ;;  %v3064_v37 = vld [vmem:[%s4487_s0 + $0x300] sm:$0xf0] }
 0x10f   :  { %v1275_v17 = vadd.f32 %v1274_v5, %v1186_v48  ;;  %v1450_v8 = vadd.f32 %v1449_v3, %v1361_v63 }
 0x110   :  { %v1541_v15 = vpop.f32.mrf.mxu0 }
 0x111   :  { %v3895_v10 = vadd.f32 %v1538_v42, %v1450_v8  ;;  %1313 = vmatmul.bf16.gmra.mxu1 %v2559_v53  ;;  %1402 = vmatmul.bf16.gmra.mxu2 %v2563_v4  ;;  %v2592_v42 = vld [vmem:[%s4487_s0 + $0x2c4] sm:$0xf0]  ;;  %v2599_v4 = vor.u32 %v3057_v46, %v2598_v43 }
 0x112   :  { %v2595_v63 = vor.u32 %v3053_v40, %v2592_v42 }
 0x113   :  { %1491 = vmatmul.bf16.gmra.mxu3 %v2567_v6  ;;  %1580 = vmatmul.bf16.gmra.mxu0 %v2571_v9  ;;  %v3120_v9 = vld [vmem:[%s4488_s1 + $0x140] sm:$0xff] }
 0x114   :  { %v1363_v13 = vpop.f32.mrf.mxu2  ;;  %1613 = vmatpush.bf16.msra.mxu1 %v3120_v9  ;;  %v3071_v9 = vld [vmem:[%s4487_s0 + $0x338] sm:$0xf0] }
 0x115   :  { %v1364_v20 = vadd.f32 %v1363_v13, %v1275_v17 }
 0x116   :  { %v1452_v21 = vpop.f32.mrf.mxu3  ;;  %v1276_v28 = vpop.f32.mrf.mxu1 }
 0x117   :  { %v1277_v31 = vadd.f32 %v1276_v28, %v1188_v11  ;;  %v1453_v32 = vadd.f32 %v1452_v21, %v1364_v20  ;;  %v2618_v20 = vld [vmem:[%s4487_s0 + $0x2e0] sm:$0xf]  ;;  %v3063_v21 = vld [vmem:[%s4487_s0 + $0x2f8] sm:$0xf0] }
 0x118   :  { %v1543_v62 = vpop.f32.mrf.mxu0  ;;  %v2620_v28 = vld [vmem:[%s4487_s0 + $0x2fc] sm:$0xf0]  ;;  %v2619_v40 = vor.u32 %v3063_v21, %v2618_v20 }
 0x119   :  { %v3902_v36 = vadd.f32 %v1541_v15, %v1453_v32  ;;  %v2612_v15 = vld [vmem:[%s4487_s0 + $0x2f4] sm:$0xf0]  ;;  %v2626_v32 = vld [vmem:[%s4487_s0 + $0x2e8] sm:$0xf] }
 0x11a   :  { %v2627_v46 = vor.u32 %v3064_v37, %v2626_v32 }
 0x11c   :  { %v1365_v26 = vpop.f32.mrf.mxu2 }
 0x11d   :  { %v1366_v48 = vadd.f32 %v1365_v26, %v1277_v31 }
 0x11e   :  { %v1454_v61 = vpop.f32.mrf.mxu3  ;;  %v1279_v57 = vpop.f32.mrf.mxu1 }
 0x11f   :  { %v1280_v3 = vadd.f32 %v1279_v57, %v3598_v25  ;;  %v1455_v53 = vadd.f32 %v1454_v61, %v1366_v48  ;;  %v3059_v25 = vld [vmem:[%s4487_s0 + $0x2dc] sm:$0xf]  ;;  %v3133_v48 = vld [vmem:[%s4490_s3 + $0x20] sm:$0xff] }
 0x120   :  { %v2615_v2 = vor.u32 %v3059_v25, %v2612_v15  ;;  %1903 = vmatpush.bf16.msra.mxu3 %v3133_v48  ;;  %v2676_v48 = vld [vmem:[%s4487_s0 + $0x36c] sm:$0xf0] }
 0x121   :  { %v3929_v5 = vadd.f32 %v1543_v62, %v1455_v53  ;;  %1318 = vmatmul.bf16.gmra.mxu1 %v2587_v55  ;;  %1407 = vmatmul.bf16.gmra.mxu2 %v2591_v35  ;;  %v2646_v53 = vld [vmem:[%s4487_s0 + $0x318] sm:$0xf] }
 0x123   :  { %1496 = vmatmul.bf16.gmra.mxu3 %v2595_v63  ;;  %1585 = vmatmul.bf16.gmra.mxu0 %v2599_v4  ;;  %v3070_v4 = vld [vmem:[%s4487_s0 + $0x330] sm:$0xf0] }
 0x124   :  { %v1368_v6 = vpop.f32.mrf.mxu2  ;;  %v2647_v15 = vor.u32 %v3070_v4, %v2646_v53 }
 0x125   :  { %v1369_v17 = vadd.f32 %v1368_v6, %v1280_v3  ;;  %v2640_v3 = vld [vmem:[%s4487_s0 + $0x32c] sm:$0xf0]  ;;  %v2648_v6 = vld [vmem:[%s4487_s0 + $0x334] sm:$0xf0] }
 0x126   :  { %v1457_v8 = vpop.f32.mrf.mxu3  ;;  %v1281_v54 = vpop.f32.mrf.mxu1 }
 0x127   :  { %v1282_v11 = vadd.f32 %v1281_v54, %v3612_v34  ;;  %v3935_v13 = vadd.f32 %v1457_v8, %v1369_v17  ;;  %v3060_v34 = vld [vmem:[%s4487_s0 + $0x2e4] sm:$0xf]  ;;  %v2654_v8 = vld [vmem:[%s4487_s0 + $0x320] sm:$0xf] }
 0x128   :  { %v2623_v26 = vor.u32 %v3060_v34, %v2620_v28  ;;  %v2655_v28 = vor.u32 %v3071_v9, %v2654_v8 }
 0x12c   :  { %v1370_v31 = vpop.f32.mrf.mxu2 }
 0x12d   :  { %v3961_v38 = vadd.f32 %v1370_v31, %v1282_v11 }
 0x12e   :  { %v3963_v16 = vpop.f32.mrf.mxu3  ;;  %v1284_v42 = vpop.f32.mrf.mxu1 }
 0x12f   :  { %v1285_v43 = vadd.f32 %v1284_v42, %v3647_v52  ;;  %v3066_v52 = vld [vmem:[%s4487_s0 + $0x314] sm:$0xf] }
 0x130   :  { %v2643_v25 = vor.u32 %v3066_v52, %v2640_v3 }
 0x131   :  { %1323 = vmatmul.bf16.gmra.mxu1 %v2615_v2  ;;  %1412 = vmatmul.bf16.gmra.mxu2 %v2619_v40 }
 0x133   :  { %1501 = vmatmul.bf16.gmra.mxu3 %v2623_v26  ;;  %1590 = vmatmul.bf16.gmra.mxu0 %v2627_v46  ;;  %v3073_v26 = vld [vmem:[%s4487_s0 + $0x34c] sm:$0xf] }
 0x134   :  { %v1373_v61 = vpop.f32.mrf.mxu2  ;;  %v3077_v46 = vld [vmem:[%s4487_s0 + $0x368] sm:$0xf0] }
 0x135   :  { %v1374_v55 = vadd.f32 %v1373_v61, %v1285_v43  ;;  %v2674_v43 = vld [vmem:[%s4487_s0 + $0x350] sm:$0xf] }
 0x136   :  { %v1462_v35 = vpop.f32.mrf.mxu3  ;;  %v1286_v57 = vpop.f32.mrf.mxu1  ;;  %v2675_v3 = vor.u32 %v3077_v46, %v2674_v43 }
 0x137   :  { %v1287_v62 = vadd.f32 %v1286_v57, %v3658_v60  ;;  %v3970_v63 = vadd.f32 %v1462_v35, %v1374_v55  ;;  %v3067_v60 = vld [vmem:[%s4487_s0 + $0x31c] sm:$0xf]  ;;  %v2682_v55 = vld [vmem:[%s4487_s0 + $0x358] sm:$0xf]  ;;  %v3078_v35 = vld [vmem:[%s4487_s0 + $0x370] sm:$0xf0] }
 0x138   :  { %v2651_v21 = vor.u32 %v3067_v60, %v2648_v6  ;;  %v2683_v6 = vor.u32 %v3078_v35, %v2682_v55 }
 0x13c   :  { %v1375_v17 = vpop.f32.mrf.mxu2 }
 0x13d   :  { %v3996_v54 = vadd.f32 %v1375_v17, %v1287_v62  ;;  %v3132_v17 = vld [vmem:[%s4490_s3 + $0x18] sm:$0xff] }
 0x13e   :  { %v3998_v11 = vpop.f32.mrf.mxu3  ;;  %v1289_v20 = vpop.f32.mrf.mxu1  ;;  %1904 = vmatpush.bf16.msra.mxu3 %v3132_v17 }
 0x13f   :  { %v1290_v34 = vadd.f32 %v1289_v20, %v3693_v14  ;;  %v2668_v14 = vld [vmem:[%s4487_s0 + $0x364] sm:$0xf0] }
 0x140   :  { %v2671_v52 = vor.u32 %v3073_v26, %v2668_v14 }
 0x141   :  { %1328 = vmatmul.bf16.gmra.mxu1 %v2643_v25  ;;  %1417 = vmatmul.bf16.gmra.mxu2 %v2647_v15 }
 0x143   :  { %1506 = vmatmul.bf16.gmra.mxu3 %v2651_v21  ;;  %1595 = vmatmul.bf16.gmra.mxu0 %v2655_v28  ;;  %v2270_v28 = vld [vmem:[%s4487_s0 + $0x18] sm:$0xf] }
 0x144   :  { %v1378_v31 = vpop.f32.mrf.mxu2 }
 0x145   :  { %v1379_v32 = vadd.f32 %v1378_v31, %v1290_v34  ;;  %v2264_v34 = vld [vmem:[%s4487_s0 + $0x2c] sm:$0xf0]  ;;  %v2974_v31 = vld [vmem:[%s4487_s0 + $0x30] sm:$0xf0] }
 0x146   :  { %v1467_v37 = vpop.f32.mrf.mxu3  ;;  %v1291_v2 = vpop.f32.mrf.mxu1 }
 0x147   :  { %v1292_v40 = vadd.f32 %v1291_v2, %v3707_v24  ;;  %v4002_v42 = vadd.f32 %v1467_v37, %v1379_v32  ;;  %v3074_v24 = vld [vmem:[%s4487_s0 + $0x354] sm:$0xf] }
 0x148   :  { %v2679_v4 = vor.u32 %v3074_v24, %v2676_v48  ;;  %v3144_v48 = vld [vmem:[%s4492_s5 + $0x38] sm:$0xff] }
 0x149   :  { %2105 = vmatpush.bf16.msra.mxu0 %v3144_v48 }
 0x14c   :  { %v1380_v61 = vpop.f32.mrf.mxu2 }
 0x14d   :  { %v4028_v57 = vadd.f32 %v1380_v61, %v1292_v40  ;;  %v2271_v40 = vor.u32 %v2974_v31, %v2270_v28 }
 0x14e   :  { %v4030_v62 = vpop.f32.mrf.mxu3  ;;  %v1294_v53 = vpop.f32.mrf.mxu1 }
 0x14f   :  { %v1295_v60 = vadd.f32 %v1294_v53, %v3742_v49  ;;  %v2970_v49 = vld [vmem:[%s4487_s0 + $0x14] sm:$0xf]  ;;  %v2981_v53 = vld [vmem:[%s4487_s0 + $0x68] sm:$0xf0] }
 0x150   :  { %v2267_v2 = vor.u32 %v2970_v49, %v2264_v34 }
 0x151   :  { %1333 = vmatmul.bf16.gmra.mxu1 %v2671_v52  ;;  %1422 = vmatmul.bf16.gmra.mxu2 %v2675_v3  ;;  %v2292_v52 = vld [vmem:[%s4487_s0 + $0x64] sm:$0xf0]  ;;  %v2298_v3 = vld [vmem:[%s4487_s0 + $0x50] sm:$0xf] }
 0x152   :  { %v2299_v17 = vor.u32 %v2981_v53, %v2298_v3 }
 0x153   :  { %1511 = vmatmul.bf16.gmra.mxu3 %v2679_v4  ;;  %1600 = vmatmul.bf16.gmra.mxu0 %v2683_v6 }
 0x154   :  { %v1383_v8 = vpop.f32.mrf.mxu2 }
 0x155   :  { %v1384_v9 = vadd.f32 %v1383_v8, %v1295_v60 }
 0x156   :  { %v1472_v25 = vpop.f32.mrf.mxu3  ;;  %v1296_v15 = vpop.f32.mrf.mxu1 }
 0x157   :  { %v1297_v20 = vadd.f32 %v1296_v15, %v3756_v1  ;;  %v4037_v21 = vadd.f32 %v1472_v25, %v1384_v9  ;;  %v3131_v25 = vld [vmem:[%s4490_s3 + $0x10] sm:$0xff] }
 0x158   :  { %1905 = vmatpush.bf16.msra.mxu3 %v3131_v25 }
 0x15c   :  { %v1385_v32 = vpop.f32.mrf.mxu2 }
 0x15d   :  { %v4051_v1 = vadd.f32 %v1385_v32, %v1297_v20  ;;  %v2320_v32 = vld [vmem:[%s4487_s0 + $0x9c] sm:$0xf0] }
 0x15e   :  { %v4053_v37 = vpop.f32.mrf.mxu3  ;;  %v1299_v26 = vpop.f32.mrf.mxu1 }
 0x15f   :  { %v1300_v14 = vadd.f32 %v1299_v26, %v3603_v29  ;;  %v2977_v29 = vld [vmem:[%s4487_s0 + $0x4c] sm:$0xf] }
 0x160   :  { %v2295_v6 = vor.u32 %v2977_v29, %v2292_v52  ;;  %v3143_v52 = vld [vmem:[%s4492_s5 + $0x30] sm:$0xff] }
 0x161   :  { %1614 = vmatmul.bf16.vlgmr.msra.gmra.mxu1 %v2267_v2  ;;  %2888 = vmatmul.msk.bf16.vlgmr.msra.gmra.mxu2 %vm1112_vm0, %v2271_v40  ;;  %v2326_v2 = vld [vmem:[%s4487_s0 + $0x88] sm:$0xf]  ;;  %v2988_v40 = vld [vmem:[%s4487_s0 + $0xa0] sm:$0xf0] }
 0x162   :  { %2106 = vmatpush.bf16.msra.mxu0 %v3143_v52 }
 0x164   :  { %v1388_v43 = vpop.f32.mrf.mxu2 }
 0x165   :  { %v1389_v46 = vadd.f32 %v1388_v43, %v1300_v14 }
 0x166   :  { %v1477_v24 = vpop.f32.mrf.mxu3  ;;  %v1301_v61 = vpop.f32.mrf.mxu1 }
 0x167   :  { %v1302_v55 = vadd.f32 %v1301_v61, %v3641_v45  ;;  %v4061_v35 = vadd.f32 %v1477_v24, %v1389_v46  ;;  %v2327_v46 = vor.u32 %v2988_v40, %v2326_v2 }
 0x16c   :  { %v1390_v45 = vpop.f32.mrf.mxu2 }
 0x16d   :  { %v4075_v4 = vadd.f32 %v1390_v45, %v1302_v55 }
 0x16e   :  { %v4077_v60 = vpop.f32.mrf.mxu3  ;;  %v1304_v8 = vpop.f32.mrf.mxu1 }
 0x16f   :  { %v1305_v9 = vadd.f32 %v1304_v8, %v3652_v56  ;;  %v2984_v56 = vld [vmem:[%s4487_s0 + $0x84] sm:$0xf]  ;;  %v2995_v8 = vld [vmem:[%s4487_s0 + $0xd8] sm:$0xf0] }
 0x170   :  { %v2323_v43 = vor.u32 %v2984_v56, %v2320_v32 }
 0x171   :  { %1619 = vmatmul.bf16.gmra.mxu1 %v2295_v6  ;;  %2889 = vmatmul.msk.bf16.gmra.mxu2 %vm1112_vm0, %v2299_v17  ;;  %v2348_v6 = vld [vmem:[%s4487_s0 + $0xd4] sm:$0xf0]  ;;  %v2354_v17 = vld [vmem:[%s4487_s0 + $0xc0] sm:$0xf] }
 0x174   :  { %v1393_v15 = vpop.f32.mrf.mxu2 }
 0x175   :  { %v1394_v20 = vadd.f32 %v1393_v15, %v1305_v9 }
 0x176   :  { %v1482_v49 = vpop.f32.mrf.mxu3  ;;  %v1306_v34 = vpop.f32.mrf.mxu1 }
 0x177   :  { %v1307_v28 = vadd.f32 %v1306_v34, %v3687_v7  ;;  %v4085_v31 = vadd.f32 %v1482_v49, %v1394_v20  ;;  %v2355_v20 = vor.u32 %v2995_v8, %v2354_v17  ;;  %v3142_v8 = vld [vmem:[%s4492_s5 + $0x28] sm:$0xff] }
 0x178   :  { %2107 = vmatpush.bf16.msra.mxu0 %v3142_v8 }
 0x17c   :  { %v1395_v26 = vpop.f32.mrf.mxu2 }
 0x17d   :  { %v4099_v7 = vadd.f32 %v1395_v26, %v1307_v28  ;;  %v3130_v28 = vld [vmem:[%s4490_s3 + $0x8] sm:$0xff] }
 0x17e   :  { %v4101_v14 = vpop.f32.mrf.mxu3  ;;  %v1309_v24 = vpop.f32.mrf.mxu1  ;;  %1906 = vmatpush.bf16.msra.mxu3 %v3130_v28  ;;  %v3009_v28 = vld [vmem:[%s4487_s0 + $0x148] sm:$0xf0] }
 0x17f   :  { %v1310_v48 = vadd.f32 %v1309_v24, %v3698_v19  ;;  %v2991_v19 = vld [vmem:[%s4487_s0 + $0xbc] sm:$0xf]  ;;  %v2382_v24 = vld [vmem:[%s4487_s0 + $0xf8] sm:$0xf] }
 0x180   :  { %v2351_v15 = vor.u32 %v2991_v19, %v2348_v6 }
 0x181   :  { %1624 = vmatmul.bf16.gmra.mxu1 %v2323_v43  ;;  %2890 = vmatmul.msk.bf16.gmra.mxu2 %vm1112_vm0, %v2327_v46  ;;  %v2376_v46 = vld [vmem:[%s4487_s0 + $0x10c] sm:$0xf0] }
 0x184   :  { %v1398_v61 = vpop.f32.mrf.mxu2 }
 0x185   :  { %v1399_v55 = vadd.f32 %v1398_v61, %v1310_v48  ;;  %v3002_v48 = vld [vmem:[%s4487_s0 + $0x110] sm:$0xf0] }
 0x186   :  { %v1487_v29 = vpop.f32.mrf.mxu3  ;;  %v1311_v3 = vpop.f32.mrf.mxu1  ;;  %v2383_v52 = vor.u32 %v3002_v48, %v2382_v24 }
 0x187   :  { %v1312_v53 = vadd.f32 %v1311_v3, %v3736_v41  ;;  %v4109_v45 = vadd.f32 %v1487_v29, %v1399_v55 }
 0x18c   :  { %v1400_v41 = vpop.f32.mrf.mxu2 }
 0x18d   :  { %v4123_v9 = vadd.f32 %v1400_v41, %v1312_v53 }
 0x18e   :  { %v4125_v25 = vpop.f32.mrf.mxu3  ;;  %v1314_v49 = vpop.f32.mrf.mxu1 }
 0x18f   :  { %v1315_v34 = vadd.f32 %v1314_v49, %v3750_v58  ;;  %v2998_v58 = vld [vmem:[%s4487_s0 + $0xf4] sm:$0xf]  ;;  %v2404_v49 = vld [vmem:[%s4487_s0 + $0x144] sm:$0xf0] }
 0x190   :  { %v2379_v29 = vor.u32 %v2998_v58, %v2376_v46  ;;  %v3129_v46 = vld [vmem:[%s4490_s3] sm:$0xff] }
 0x191   :  { %1629 = vmatmul.bf16.gmra.mxu1 %v2351_v15  ;;  %2891 = vmatmul.msk.bf16.gmra.mxu2 %vm1112_vm0, %v2355_v20 }
 0x192   :  { %1907 = vmatpush.bf16.msra.mxu3 %v3129_v46  ;;  %v3019_v46 = vld [vmem:[%s4487_s0 + $0x19c] sm:$0xf] }
 0x194   :  { %v1403_v56 = vpop.f32.mrf.mxu2 }
 0x195   :  { %v1404_v32 = vadd.f32 %v1403_v56, %v1315_v34  ;;  %v2410_v34 = vld [vmem:[%s4487_s0 + $0x130] sm:$0xf] }
 0x196   :  { %v1492_v2 = vpop.f32.mrf.mxu3  ;;  %v1316_v40 = vpop.f32.mrf.mxu1 }
 0x197   :  { %v1317_v26 = vadd.f32 %v1316_v40, %v3787_v18  ;;  %v4133_v43 = vadd.f32 %v1492_v2, %v1404_v32  ;;  %v2411_v40 = vor.u32 %v3009_v28, %v2410_v34 }
 0x19c   :  { %v1405_v61 = vpop.f32.mrf.mxu2 }
 0x19d   :  { %v4147_v18 = vadd.f32 %v1405_v61, %v1317_v26 }
 0x19e   :  { %v4149_v55 = vpop.f32.mrf.mxu3  ;;  %v1319_v3 = vpop.f32.mrf.mxu1 }
 0x19f   :  { %v1320_v53 = vadd.f32 %v1319_v3, %v3609_v33  ;;  %v3005_v33 = vld [vmem:[%s4487_s0 + $0x12c] sm:$0xf] }
 0x1a0   :  { %v2407_v2 = vor.u32 %v3005_v33, %v2404_v49 }
 0x1a1   :  { %1634 = vmatmul.bf16.gmra.mxu1 %v2379_v29  ;;  %2892 = vmatmul.msk.bf16.gmra.mxu2 %vm1112_vm0, %v2383_v52 }
 0x1a4   :  { %v1408_v19 = vpop.f32.mrf.mxu2 }
 0x1a5   :  { %v1409_v6 = vadd.f32 %v1408_v19, %v1320_v53  ;;  %v2432_v53 = vld [vmem:[%s4487_s0 + $0x17c] sm:$0xf0]  ;;  %v2438_v19 = vld [vmem:[%s4487_s0 + $0x168] sm:$0xf] }
 0x1a6   :  { %v1497_v17 = vpop.f32.mrf.mxu3  ;;  %v1321_v41 = vpop.f32.mrf.mxu1 }
 0x1a7   :  { %v1322_v15 = vadd.f32 %v1321_v41, %v3644_v50  ;;  %v4157_v20 = vadd.f32 %v1497_v17, %v1409_v6  ;;  %v3016_v6 = vld [vmem:[%s4487_s0 + $0x180] sm:$0xf0] }
 0x1ac   :  { %v1410_v50 = vpop.f32.mrf.mxu2 }
 0x1ad   :  { %v4171_v56 = vadd.f32 %v1410_v50, %v1322_v15  ;;  %v2439_v15 = vor.u32 %v3016_v6, %v2438_v19 }
 0x1ae   :  { %v4173_v32 = vpop.f32.mrf.mxu3  ;;  %v1324_v26 = vpop.f32.mrf.mxu1 }
 0x1af   :  { %v1325_v58 = vadd.f32 %v1324_v26, %v3655_v59  ;;  %v3012_v59 = vld [vmem:[%s4487_s0 + $0x164] sm:$0xf] }
 0x1b0   :  { %v2435_v41 = vor.u32 %v3012_v59, %v2432_v53 }
 0x1b1   :  { %1639 = vmatmul.bf16.gmra.mxu1 %v2407_v2  ;;  %2893 = vmatmul.msk.bf16.gmra.mxu2 %vm1112_vm0, %v2411_v40 }
 0x1b4   :  { %v1413_v24 = vpop.f32.mrf.mxu2 }
 0x1b5   :  { %v1414_v48 = vadd.f32 %v1413_v24, %v1325_v58  ;;  %v3141_v58 = vld [vmem:[%s4492_s5 + $0x20] sm:$0xff] }
 0x1b6   :  { %v1502_v61 = vpop.f32.mrf.mxu3  ;;  %v1326_v29 = vpop.f32.mrf.mxu1  ;;  %2108 = vmatpush.bf16.msra.mxu0 %v3141_v58  ;;  %v2466_v24 = vld [vmem:[%s4487_s0 + $0x1a0] sm:$0xf] }
 0x1b7   :  { %v1327_v52 = vadd.f32 %v1326_v29, %v3690_v12  ;;  %v4181_v3 = vadd.f32 %v1502_v61, %v1414_v48 }
 0x1bc   :  { %v1415_v17 = vpop.f32.mrf.mxu2 }
 0x1bd   :  { %v4195_v12 = vadd.f32 %v1415_v17, %v1327_v52 }
 0x1be   :  { %v4197_v8 = vpop.f32.mrf.mxu3  ;;  %v1329_v33 = vpop.f32.mrf.mxu1 }
 0x1bf   :  { %v1330_v49 = vadd.f32 %v1329_v33, %v3704_v23  ;;  %v2460_v23 = vld [vmem:[%s4487_s0 + $0x1b4] sm:$0xf0] }
 0x1c0   :  { %v2463_v52 = vor.u32 %v3019_v46, %v2460_v23 }
 0x1c1   :  { %1644 = vmatmul.bf16.gmra.mxu1 %v2435_v41  ;;  %2894 = vmatmul.msk.bf16.gmra.mxu2 %vm1112_vm0, %v2439_v15 }
 0x1c4   :  { %v1418_v34 = vpop.f32.mrf.mxu2 }
 0x1c5   :  { %v1419_v28 = vadd.f32 %v1418_v34, %v1330_v49  ;;  %v3026_v34 = vld [vmem:[%s4487_s0 + $0x1d4] sm:$0xf] }
 0x1c6   :  { %v1507_v50 = vpop.f32.mrf.mxu3  ;;  %v1331_v2 = vpop.f32.mrf.mxu1 }
 0x1c7   :  { %v1332_v40 = vadd.f32 %v1331_v2, %v3739_v47  ;;  %v4202_v26 = vadd.f32 %v1507_v50, %v1419_v28  ;;  %v3023_v47 = vld [vmem:[%s4487_s0 + $0x1b8] sm:$0xf0]  ;;  %v2488_v28 = vld [vmem:[%s4487_s0 + $0x1ec] sm:$0xf0]  ;;  %v3030_v50 = vld [vmem:[%s4487_s0 + $0x1f0] sm:$0xf0] }
 0x1c8   :  { %v2467_v59 = vor.u32 %v3023_v47, %v2466_v24  ;;  %v3140_v47 = vld [vmem:[%s4492_s5 + $0x18] sm:$0xff] }
 0x1c9   :  { %2109 = vmatpush.bf16.msra.mxu0 %v3140_v47  ;;  %v2550_v47 = vld [vmem:[%s4487_s0 + $0x248] sm:$0xf] }
 0x1cc   :  { %v1420_v48 = vpop.f32.mrf.mxu2 }
 0x1cd   :  { %v4219_v61 = vadd.f32 %v1420_v48, %v1332_v40  ;;  %v2491_v40 = vor.u32 %v3026_v34, %v2488_v28  ;;  %v4260_v28 = vpop.f32.mrf.mxu0 }
 0x1ce   :  { %v4221_v29 = vpop.f32.mrf.mxu3  ;;  %v1334_v53 = vpop.f32.mrf.mxu1 }
 0x1cf   :  { %v1335_v19 = vadd.f32 %v1334_v53, %v3753_v0  ;;  %v2494_v0 = vld [vmem:[%s4487_s0 + $0x1d8] sm:$0xf]  ;;  %v2522_v53 = vld [vmem:[%s4487_s0 + $0x210] sm:$0xf] }
 0x1d0   :  { %v2495_v58 = vor.u32 %v3030_v50, %v2494_v0 }
 0x1d1   :  { %1649 = vmatmul.bf16.gmra.mxu1 %v2463_v52  ;;  %2895 = vmatmul.msk.bf16.gmra.mxu2 %vm1112_vm0, %v2467_v59  ;;  %v3033_v52 = vld [vmem:[%s4487_s0 + $0x20c] sm:$0xf]  ;;  %v2516_v59 = vld [vmem:[%s4487_s0 + $0x224] sm:$0xf0] }
 0x1d4   :  { %v1423_v6 = vpop.f32.mrf.mxu2 }
 0x1d5   :  { %v1424_v17 = vadd.f32 %v1423_v6, %v1335_v19  ;;  %v3037_v19 = vld [vmem:[%s4487_s0 + $0x228] sm:$0xf0] }
 0x1d6   :  { %v1512_v41 = vpop.f32.mrf.mxu3  ;;  %v1336_v15 = vpop.f32.mrf.mxu1 }
 0x1d7   :  { %v1337_v33 = vadd.f32 %v1336_v15, %v3790_v22  ;;  %v4226_v49 = vadd.f32 %v1512_v41, %v1424_v17  ;;  %v2519_v15 = vor.u32 %v3033_v52, %v2516_v59 }
 0x1dc   :  { %v1425_v2 = vpop.f32.mrf.mxu2 }
 0x1dd   :  { %v4240_v22 = vadd.f32 %v1425_v2, %v1337_v33  ;;  %v2523_v33 = vor.u32 %v3037_v19, %v2522_v53 }
 0x1de   :  { %v1615_v46 = vpop.f32.mrf.mxu1 }
 0x1df   :  { %v1616_v48 = vadd.f32 %v1615_v46, %v3797_v51  ;;  %v4263_v46 = vpop.f32.mrf.mxu0 }
 0x1e1   :  { %1654 = vmatmul.bf16.gmra.mxu1 %v2491_v40  ;;  %2896 = vmatmul.msk.bf16.gmra.mxu2 %vm1112_vm0, %v2495_v58 }
 0x1e4   :  { %v1704_v23 = vpop.f32.mrf.mxu2 }
 0x1e5   :  { %v1705_v6 = vadd.f32 %v1704_v23, %v1616_v48  ;;  %v3040_v23 = vld [vmem:[%s4487_s0 + $0x244] sm:$0xf] }
 0x1e6   :  { %v1617_v24 = vpop.f32.mrf.mxu1  ;;  %v3044_v48 = vld [vmem:[%s4487_s0 + $0x260] sm:$0xf0] }
 0x1e7   :  { %v1618_v51 = vadd.f32 %v1617_v24, %v3825_v30  ;;  %v1784_v0 = vmax.f32 %v1705_v6, 0.0  ;;  %v2544_v24 = vld [vmem:[%s4487_s0 + $0x25c] sm:$0xf0]  ;;  %v2551_v6 = vor.u32 %v3044_v48, %v2550_v47 }
 0x1e8   :  { %v2547_v19 = vor.u32 %v3040_v23, %v2544_v24 }
 0x1ec   :  { %v1706_v17 = vpop.f32.mrf.mxu2 }
 0x1ed   :  { %v1707_v41 = vadd.f32 %v1706_v17, %v1618_v51 }
 0x1ee   :  { %v1620_v34 = vpop.f32.mrf.mxu1 }
 0x1ef   :  { %v1785_v50 = vmax.f32 %v1707_v41, 0.0  ;;  %v1621_v30 = vadd.f32 %v1620_v34, %v3832_v44 }
 0x1f1   :  { %v1816_v2 = vpack.c.bf16 %v1785_v50, %v1784_v0  ;;  %1659 = vmatmul.bf16.gmra.mxu1 %v2519_v15  ;;  %2897 = vmatmul.msk.bf16.gmra.mxu2 %vm1112_vm0, %v2523_v33  ;;  %v4280_v33 = vpop.f32.mrf.mxu0 }
 0x1f3   :  { %1908 = vmatmul.bf16.vlgmr.msra.gmra.mxu3 %v1816_v2  ;;  %v3047_v2 = vld [vmem:[%s4487_s0 + $0x27c] sm:$0xf] }
 0x1f4   :  { %v1709_v40 = vpop.f32.mrf.mxu2 }
 0x1f5   :  { %v1710_v52 = vadd.f32 %v1709_v40, %v1621_v30  ;;  %v2572_v40 = vld [vmem:[%s4487_s0 + $0x294] sm:$0xf0]  ;;  %v3051_v30 = vld [vmem:[%s4487_s0 + $0x298] sm:$0xf0] }
 0x1f6   :  { %v1622_v58 = vpop.f32.mrf.mxu1 }
 0x1f7   :  { %v1623_v59 = vadd.f32 %v1622_v58, %v3860_v27  ;;  %v1786_v17 = vmax.f32 %v1710_v52, 0.0  ;;  %v3139_v27 = vld [vmem:[%s4492_s5 + $0x10] sm:$0xff]  ;;  %v2578_v58 = vld [vmem:[%s4487_s0 + $0x280] sm:$0xf]  ;;  %v2575_v52 = vor.u32 %v3047_v2, %v2572_v40 }
 0x1f8   :  { %2110 = vmatpush.bf16.msra.mxu0 %v3139_v27  ;;  %v3058_v27 = vld [vmem:[%s4487_s0 + $0x2d0] sm:$0xf0] }
 0x1f9   :  { %v4299_v47 = vpop.f32.mrf.mxu0 }
 0x1fc   :  { %v1711_v44 = vpop.f32.mrf.mxu2 }
 0x1fd   :  { %v1712_v53 = vadd.f32 %v1711_v44, %v1623_v59  ;;  %v2579_v59 = vor.u32 %v3051_v30, %v2578_v58 }
 0x1fe   :  { %v1625_v51 = vpop.f32.mrf.mxu1 }
 0x1ff   :  { %v1787_v41 = vmax.f32 %v1712_v53, 0.0  ;;  %v1626_v50 = vadd.f32 %v1625_v51, %v3867_v39 }
 0x201   :  { %1664 = vmatmul.bf16.gmra.mxu1 %v2547_v19  ;;  %2898 = vmatmul.msk.bf16.gmra.mxu2 %vm1112_vm0, %v2551_v6  ;;  %v1817_v15 = vpack.c.bf16 %v1787_v41, %v1786_v17  ;;  %v4302_v41 = vpop.f32.mrf.mxu0 }
 0x203   :  { %1913 = vmatmul.bf16.gmra.mxu3 %v1817_v15  ;;  %v3054_v15 = vld [vmem:[%s4487_s0 + $0x2b4] sm:$0xf] }
 0x204   :  { %v1714_v34 = vpop.f32.mrf.mxu2 }
 0x205   :  { %v1715_v23 = vadd.f32 %v1714_v34, %v1626_v50  ;;  %v2600_v34 = vld [vmem:[%s4487_s0 + $0x2cc] sm:$0xf0] }
 0x206   :  { %v1627_v0 = vpop.f32.mrf.mxu1  ;;  %v2603_v58 = vor.u32 %v3054_v15, %v2600_v34 }
 0x207   :  { %v1628_v39 = vadd.f32 %v1627_v0, %v3895_v10  ;;  %v1788_v53 = vmax.f32 %v1715_v23, 0.0  ;;  %v2606_v0 = vld [vmem:[%s4487_s0 + $0x2b8] sm:$0xf] }
 0x208   :  { %v2607_v30 = vor.u32 %v3058_v27, %v2606_v0 }
 0x20c   :  { %v1716_v24 = vpop.f32.mrf.mxu2 }
 0x20d   :  { %v1717_v48 = vadd.f32 %v1716_v24, %v1628_v39 }
 0x20e   :  { %v1630_v44 = vpop.f32.mrf.mxu1 }
 0x20f   :  { %v1789_v19 = vmax.f32 %v1717_v48, 0.0  ;;  %v1631_v10 = vadd.f32 %v1630_v44, %v3902_v36  ;;  %v1558_v48 = vpop.f32.mrf.mxu0  ;;  %v1460_v44 = vadd.f32 %v3963_v16, %v3961_v38  ;;  %v2628_v38 = vld [vmem:[%s4487_s0 + $0x304] sm:$0xf0]  ;;  %v3065_v16 = vld [vmem:[%s4487_s0 + $0x308] sm:$0xf0] }
 0x211   :  { %1669 = vmatmul.bf16.gmra.mxu1 %v2575_v52  ;;  %2899 = vmatmul.msk.bf16.gmra.mxu2 %vm1112_vm0, %v2579_v59  ;;  %v1818_v6 = vpack.c.bf16 %v1789_v19, %v1788_v53  ;;  %v3138_v19 = vld [vmem:[%s4492_s5 + $0x8] sm:$0xff] }
 0x212   :  { %2111 = vmatpush.bf16.msra.mxu0 %v3138_v19 }
 0x213   :  { %1918 = vmatmul.bf16.gmra.mxu3 %v1818_v6  ;;  %v1549_v6 = vadd.f32 %v4263_v46, %v1460_v44  ;;  %v3068_v44 = vld [vmem:[%s4487_s0 + $0x324] sm:$0xf] }
 0x214   :  { %v1719_v51 = vpop.f32.mrf.mxu2 }
 0x215   :  { %v1720_v50 = vadd.f32 %v1719_v51, %v1631_v10 }
 0x216   :  { %v1632_v17 = vpop.f32.mrf.mxu1 }
 0x217   :  { %v1633_v2 = vadd.f32 %v1632_v17, %v3929_v5  ;;  %v1790_v39 = vmax.f32 %v1720_v50, 0.0  ;;  %v1547_v5 = vadd.f32 %v4260_v28, %v3935_v13  ;;  %v3061_v17 = vld [vmem:[%s4487_s0 + $0x2ec] sm:$0xf]  ;;  %v2634_v13 = vld [vmem:[%s4487_s0 + $0x2f0] sm:$0xf]  ;;  %v4339_v28 = vpop.f32.mrf.mxu0 }
 0x218   :  { %v2631_v0 = vor.u32 %v3061_v17, %v2628_v38  ;;  %v2635_v27 = vor.u32 %v3065_v16, %v2634_v13 }
 0x21c   :  { %v1721_v36 = vpop.f32.mrf.mxu2 }
 0x21d   :  { %v1722_v40 = vadd.f32 %v1721_v36, %v1633_v2 }
 0x21e   :  { %v1635_v23 = vpop.f32.mrf.mxu1 }
 0x21f   :  { %v1791_v24 = vmax.f32 %v1722_v40, 0.0  ;;  %v1636_v51 = vadd.f32 %v1635_v23, %v1547_v5  ;;  %v1563_v23 = vpop.f32.mrf.mxu0 }
 0x221   :  { %1674 = vmatmul.bf16.gmra.mxu1 %v2603_v58  ;;  %2900 = vmatmul.msk.bf16.gmra.mxu2 %vm1112_vm0, %v2607_v30  ;;  %v1819_v52 = vpack.c.bf16 %v1791_v24, %v1790_v39  ;;  %v1465_v30 = vadd.f32 %v3998_v11, %v3996_v54  ;;  %v1552_v24 = vadd.f32 %v4280_v33, %v3970_v63  ;;  %v2662_v54 = vld [vmem:[%s4487_s0 + $0x328] sm:$0xf]  ;;  %v3072_v11 = vld [vmem:[%s4487_s0 + $0x340] sm:$0xf0] }
 0x223   :  { %1923 = vmatmul.bf16.gmra.mxu3 %v1819_v52  ;;  %v1554_v52 = vadd.f32 %v4299_v47, %v1465_v30 }
 0x224   :  { %v1724_v59 = vpop.f32.mrf.mxu2 }
 0x225   :  { %v1725_v46 = vadd.f32 %v1724_v59, %v1636_v51 }
 0x226   :  { %v1637_v53 = vpop.f32.mrf.mxu1 }
 0x227   :  { %v1638_v10 = vadd.f32 %v1637_v53, %v1549_v6  ;;  %v1792_v2 = vmax.f32 %v1725_v46, 0.0  ;;  %v2656_v53 = vld [vmem:[%s4487_s0 + $0x33c] sm:$0xf0]  ;;  %v2663_v6 = vor.u32 %v3072_v11, %v2662_v54  ;;  %v1566_v17 = vpop.f32.mrf.mxu0  ;;  %v1475_v11 = vadd.f32 %v4053_v37, %v4051_v1 }
 0x228   :  { %v2659_v19 = vor.u32 %v3068_v44, %v2656_v53  ;;  %v1480_v1 = vadd.f32 %v4077_v60, %v4075_v4  ;;  %v1485_v4 = vadd.f32 %v4101_v14, %v4099_v7 }
 0x22c   :  { %v1726_v15 = vpop.f32.mrf.mxu2 }
 0x22d   :  { %v1727_v34 = vadd.f32 %v1726_v15, %v1638_v10  ;;  %v1470_v10 = vadd.f32 %v4030_v62, %v4028_v57  ;;  %v2684_v57 = vld [vmem:[%s4487_s0 + $0x374] sm:$0xf0]  ;;  %v3079_v62 = vld [vmem:[%s4487_s0 + $0x378] sm:$0xf0] }
 0x22e   :  { %v1640_v50 = vpop.f32.mrf.mxu1 }
 0x22f   :  { %v1793_v36 = vmax.f32 %v1727_v34, 0.0  ;;  %v1641_v59 = vadd.f32 %v1640_v50, %v1552_v24  ;;  %v1557_v34 = vadd.f32 %v4302_v41, %v4002_v42  ;;  %v1568_v50 = vpop.f32.mrf.mxu0  ;;  %v2690_v42 = vld [vmem:[%s4487_s0 + $0x360] sm:$0xf] }
 0x231   :  { %v1820_v40 = vpack.c.bf16 %v1793_v36, %v1792_v2  ;;  %1679 = vmatmul.bf16.gmra.mxu1 %v2631_v0  ;;  %2901 = vmatmul.msk.bf16.gmra.mxu2 %vm1112_vm0, %v2635_v27  ;;  %v3137_v0 = vld [vmem:[%s4492_s5] sm:$0xff]  ;;  %v1559_v27 = vadd.f32 %v1558_v48, %v1470_v10  ;;  %v3075_v36 = vld [vmem:[%s4487_s0 + $0x35c] sm:$0xf] }
 0x232   :  { %2112 = vmatpush.bf16.msra.mxu0 %v3137_v0  ;;  %v2687_v30 = vor.u32 %v3075_v36, %v2684_v57  ;;  %v1567_v0 = vadd.f32 %v1566_v17, %v4061_v35 }
 0x233   :  { %1928 = vmatmul.bf16.gmra.mxu3 %v1820_v40 }
 0x234   :  { %v1729_v58 = vpop.f32.mrf.mxu2 }
 0x235   :  { %v1730_v63 = vadd.f32 %v1729_v58, %v1641_v59 }
 0x236   :  { %v1642_v39 = vpop.f32.mrf.mxu1 }
 0x237   :  { %v1643_v33 = vadd.f32 %v1642_v39, %v1554_v52  ;;  %v1794_v38 = vmax.f32 %v1730_v63, 0.0  ;;  %v2691_v39 = vor.u32 %v3079_v62, %v2690_v42  ;;  %v1571_v53 = vpop.f32.mrf.mxu0  ;;  %v4387_v42 = vpop.f32.mrf.mxu3 }
 0x238   :  { %v1572_v17 = vadd.f32 %v1571_v53, %v4085_v31 }
 0x23c   :  { %v1731_v47 = vpop.f32.mrf.mxu2 }
 0x23d   :  { %v1732_v5 = vadd.f32 %v1731_v47, %v1643_v33  ;;  %v1562_v33 = vadd.f32 %v4339_v28, %v4037_v21  ;;  %v1564_v47 = vadd.f32 %v1563_v23, %v1475_v11  ;;  %v1569_v28 = vadd.f32 %v1568_v50, %v1480_v1 }
 0x23e   :  { %v1645_v51 = vpop.f32.mrf.mxu1 }
 0x23f   :  { %v1795_v13 = vmax.f32 %v1732_v5, 0.0  ;;  %v1646_v2 = vadd.f32 %v1645_v51, %v1557_v34 }
 0x241   :  { %v1821_v16 = vpack.c.bf16 %v1795_v13, %v1794_v38  ;;  %1684 = vmatmul.bf16.gmra.mxu1 %v2659_v19  ;;  %2902 = vmatmul.msk.bf16.gmra.mxu2 %vm1112_vm0, %v2663_v6  ;;  %v1573_v38 = vpop.f32.mrf.mxu0 }
 0x242   :  { %v1574_v50 = vadd.f32 %v1573_v38, %v1485_v4  ;;  %v1490_v38 = vadd.f32 %v4125_v25, %v4123_v9 }
 0x243   :  { %1933 = vmatmul.bf16.gmra.mxu3 %v1821_v16 }
 0x244   :  { %v1734_v46 = vpop.f32.mrf.mxu2 }
 0x245   :  { %v1735_v41 = vadd.f32 %v1734_v46, %v1646_v2 }
 0x246   :  { %v1647_v15 = vpop.f32.mrf.mxu1 }
 0x247   :  { %v1648_v48 = vadd.f32 %v1647_v15, %v1559_v27  ;;  %v1796_v52 = vmax.f32 %v1735_v41, 0.0 }
 0x249   :  { %v1576_v21 = vpop.f32.mrf.mxu0 }
 0x24c   :  { %v1736_v40 = vpop.f32.mrf.mxu2 }
 0x24d   :  { %v1737_v58 = vadd.f32 %v1736_v40, %v1648_v48 }
 0x24e   :  { %v1650_v24 = vpop.f32.mrf.mxu1 }
 0x24f   :  { %v1797_v59 = vmax.f32 %v1737_v58, 0.0  ;;  %v1651_v5 = vadd.f32 %v1650_v24, %v1562_v33  ;;  %v4395_v24 = vld [vmem:[%s4491_s4] ss:$0 sm:$0xff] }
 0x251   :  { %v1822_v44 = vpack.c.bf16 %v1797_v59, %v1796_v52  ;;  %1689 = vmatmul.bf16.gmra.mxu1 %v2687_v30  ;;  %2903 = vmatmul.msk.bf16.gmra.mxu2 %vm1112_vm0, %v2691_v39  ;;  %v1578_v40 = vpop.f32.mrf.mxu0 }
 0x253   :  { %1938 = vmatmul.bf16.gmra.mxu3 %v1822_v44 }
 0x254   :  { %v1739_v54 = vpop.f32.mrf.mxu2 }
 0x255   :  { %v1740_v19 = vadd.f32 %v1739_v54, %v1651_v5 }
 0x256   :  { %v1652_v63 = vpop.f32.mrf.mxu1 }
 0x257   :  { %v1653_v6 = vadd.f32 %v1652_v63, %v1564_v47  ;;  %v1798_v46 = vmax.f32 %v1740_v19, 0.0 }
 0x259   :  { %v1581_v52 = vpop.f32.mrf.mxu0 }
 0x25a   :  { %v1582_v4 = vadd.f32 %v1581_v52, %v4133_v43 }
 0x25c   :  { %v1741_v51 = vpop.f32.mrf.mxu2 }
 0x25d   :  { %v1742_v13 = vadd.f32 %v1741_v51, %v1653_v6 }
 0x25e   :  { %v1655_v16 = vpop.f32.mrf.mxu1 }
 0x25f   :  { %v1799_v10 = vmax.f32 %v1742_v13, 0.0  ;;  %v1656_v23 = vadd.f32 %v1655_v16, %v1567_v0 }
 0x261   :  { %v1823_v15 = vpack.c.bf16 %v1799_v10, %v1798_v46  ;;  %v1583_v13 = vpop.f32.mrf.mxu0  ;;  %v1577_v10 = vadd.f32 %v1576_v21, %v4109_v45 }
 0x263   :  { %1943 = vmatmul.bf16.gmra.mxu3 %v1823_v15  ;;  %v1579_v15 = vadd.f32 %v1578_v40, %v1490_v38  ;;  %v1495_v40 = vadd.f32 %v4149_v55, %v4147_v18 }
 0x264   :  { %v1744_v34 = vpop.f32.mrf.mxu2 }
 0x265   :  { %v1745_v27 = vadd.f32 %v1744_v34, %v1656_v23 }
 0x266   :  { %v1657_v37 = vpop.f32.mrf.mxu1 }
 0x267   :  { %v1658_v2 = vadd.f32 %v1657_v37, %v1569_v28  ;;  %v1800_v41 = vmax.f32 %v1745_v27, 0.0 }
 0x26c   :  { %v1746_v36 = vpop.f32.mrf.mxu2 }
 0x26d   :  { %v1747_v57 = vadd.f32 %v1746_v36, %v1658_v2  ;;  %v1586_v36 = vpop.f32.mrf.mxu0 }
 0x26e   :  { %v1660_v62 = vpop.f32.mrf.mxu1 }
 0x26f   :  { %v1801_v48 = vmax.f32 %v1747_v57, 0.0  ;;  %v1661_v39 = vadd.f32 %v1660_v62, %v1572_v17 }
 0x271   :  { %v1824_v58 = vpack.c.bf16 %v1801_v48, %v1800_v41 }
 0x273   :  { %1948 = vmatmul.bf16.gmra.mxu3 %v1824_v58 }
 0x274   :  { %v1749_v30 = vpop.f32.mrf.mxu2 }
 0x275   :  { %v1750_v59 = vadd.f32 %v1749_v30, %v1661_v39 }
 0x276   :  { %v1662_v35 = vpop.f32.mrf.mxu1  ;;  %v1909_v60 = vpop.f32.mrf.mxu3 }
 0x277   :  { %v1663_v44 = vadd.f32 %v1662_v35, %v1574_v50  ;;  %v1910_v11 = vadd.f32 %v4395_v24, %v1909_v60  ;;  %v1802_v14 = vmax.f32 %v1750_v59, 0.0  ;;  %v1584_v35 = vadd.f32 %v1583_v13, %v1495_v40  ;;  %v1588_v60 = vpop.f32.mrf.mxu0 }
 0x279   :  { %v1989_v53 = vmax.f32 %v1910_v11, 0.0 }
 0x27c   :  { %v1751_v54 = vpop.f32.mrf.mxu2 }
 0x27d   :  { %v1752_v63 = vadd.f32 %v1751_v54, %v1663_v44 }
 0x27e   :  { %v1665_v33 = vpop.f32.mrf.mxu1  ;;  %v1911_v7 = vpop.f32.mrf.mxu3 }
 0x27f   :  { %v1803_v47 = vmax.f32 %v1752_v63, 0.0  ;;  %v1912_v31 = vadd.f32 %v4395_v24, %v1911_v7  ;;  %v1666_v34 = vadd.f32 %v1665_v33, %v1577_v10 }
 0x281   :  { %v1825_v5 = vpack.c.bf16 %v1803_v47, %v1802_v14  ;;  %v1990_v19 = vmax.f32 %v1912_v31, 0.0  ;;  %v1591_v31 = vpop.f32.mrf.mxu0 }
 0x283   :  { %v2021_v6 = vpack.c.bf16 %v1990_v19, %v1989_v53  ;;  %1953 = vmatmul.bf16.gmra.mxu3 %v1825_v5  ;;  %v1500_v53 = vadd.f32 %v4173_v32, %v4171_v56 }
 0x284   :  { %v1754_v51 = vpop.f32.mrf.mxu2 }
 0x285   :  { %2113 = vmatmul.bf16.vlgmr.msra.gmra.mxu0 %v2021_v6  ;;  %v1755_v1 = vadd.f32 %v1754_v51, %v1666_v34  ;;  %v1587_v6 = vadd.f32 %v1586_v36, %v4157_v20  ;;  %v1589_v51 = vadd.f32 %v1588_v60, %v1500_v53  ;;  %v1505_v36 = vadd.f32 %v4197_v8, %v4195_v12 }
 0x286   :  { %v1667_v16 = vpop.f32.mrf.mxu1  ;;  %v1914_v46 = vpop.f32.mrf.mxu3 }
 0x287   :  { %v1668_v37 = vadd.f32 %v1667_v16, %v1579_v15  ;;  %v1915_v28 = vadd.f32 %v4395_v24, %v1914_v46  ;;  %v1804_v57 = vmax.f32 %v1755_v1, 0.0 }
 0x289   :  { %v1991_v25 = vmax.f32 %v1915_v28, 0.0  ;;  %v1593_v10 = vpop.f32.mrf.mxu0 }
 0x28c   :  { %v1756_v0 = vpop.f32.mrf.mxu2 }
 0x28d   :  { %v1757_v23 = vadd.f32 %v1756_v0, %v1668_v37 }
 0x28e   :  { %v1670_v27 = vpop.f32.mrf.mxu1  ;;  %v1916_v2 = vpop.f32.mrf.mxu3 }
 0x28f   :  { %v1805_v62 = vmax.f32 %v1757_v23, 0.0  ;;  %v1917_v9 = vadd.f32 %v4395_v24, %v1916_v2  ;;  %v1671_v17 = vadd.f32 %v1670_v27, %v1582_v4 }
 0x291   :  { %v1826_v41 = vpack.c.bf16 %v1805_v62, %v1804_v57  ;;  %v1992_v48 = vmax.f32 %v1917_v9, 0.0  ;;  %v1592_v9 = vadd.f32 %v1591_v31, %v4181_v3 }
 0x293   :  { %1958 = vmatmul.bf16.gmra.mxu3 %v1826_v41  ;;  %v2022_v45 = vpack.c.bf16 %v1992_v48, %v1991_v25  ;;  %v1596_v25 = vpop.f32.mrf.mxu0  ;;  %v1594_v41 = vadd.f32 %v1593_v10, %v1505_v36 }
 0x294   :  { %v1759_v21 = vpop.f32.mrf.mxu2 }
 0x295   :  { %2118 = vmatmul.bf16.gmra.mxu0 %v2022_v45  ;;  %v1760_v50 = vadd.f32 %v1759_v21, %v1671_v17 }
 0x296   :  { %v1672_v58 = vpop.f32.mrf.mxu1  ;;  %v1919_v30 = vpop.f32.mrf.mxu3 }
 0x297   :  { %v1673_v39 = vadd.f32 %v1672_v58, %v1584_v35  ;;  %v1920_v44 = vadd.f32 %v4395_v24, %v1919_v30  ;;  %v1806_v33 = vmax.f32 %v1760_v50, 0.0 }
 0x299   :  { %v1993_v55 = vmax.f32 %v1920_v44, 0.0 }
 0x29c   :  { %v1761_v59 = vpop.f32.mrf.mxu2 }
 0x29d   :  { %v1762_v54 = vadd.f32 %v1761_v59, %v1673_v39  ;;  %v1598_v59 = vpop.f32.mrf.mxu0 }
 0x29e   :  { %v1675_v11 = vpop.f32.mrf.mxu1  ;;  %v1921_v63 = vpop.f32.mrf.mxu3 }
 0x29f   :  { %v1807_v7 = vmax.f32 %v1762_v54, 0.0  ;;  %v1922_v18 = vadd.f32 %v4395_v24, %v1921_v63  ;;  %v1676_v38 = vadd.f32 %v1675_v11, %v1587_v6  ;;  %v1510_v54 = vadd.f32 %v4221_v29, %v4219_v61 }
 0x2a1   :  { %v1827_v14 = vpack.c.bf16 %v1807_v7, %v1806_v33  ;;  %v1994_v47 = vmax.f32 %v1922_v18, 0.0  ;;  %v1597_v33 = vadd.f32 %v1596_v25, %v4202_v26  ;;  %v1599_v7 = vadd.f32 %v1598_v59, %v1510_v54 }
 0x2a3   :  { %1963 = vmatmul.bf16.gmra.mxu3 %v1827_v14  ;;  %v2023_v43 = vpack.c.bf16 %v1994_v47, %v1993_v55 }
 0x2a4   :  { %v1764_v52 = vpop.f32.mrf.mxu2 }
 0x2a5   :  { %2123 = vmatmul.bf16.gmra.mxu0 %v2023_v43  ;;  %v1765_v13 = vadd.f32 %v1764_v52, %v1676_v38  ;;  %v1601_v47 = vpop.f32.mrf.mxu0 }
 0x2a6   :  { %v1677_v5 = vpop.f32.mrf.mxu1  ;;  %v1924_v19 = vpop.f32.mrf.mxu3 }
 0x2a7   :  { %v1678_v16 = vadd.f32 %v1677_v5, %v1589_v51  ;;  %v1925_v15 = vadd.f32 %v4395_v24, %v1924_v19  ;;  %v1808_v0 = vmax.f32 %v1765_v13, 0.0 }
 0x2a9   :  { %v1995_v32 = vmax.f32 %v1925_v15, 0.0  ;;  %v1602_v15 = vadd.f32 %v1601_v47, %v4226_v49 }
 0x2ac   :  { %v1766_v46 = vpop.f32.mrf.mxu2 }
 0x2ad   :  { %v1767_v34 = vadd.f32 %v1766_v46, %v1678_v16  ;;  %v1515_v16 = vadd.f32 %v4387_v42, %v4240_v22  ;;  %v1603_v46 = vpop.f32.mrf.mxu0 }
 0x2ae   :  { %v1680_v1 = vpop.f32.mrf.mxu1  ;;  %v1926_v37 = vpop.f32.mrf.mxu3 }
 0x2af   :  { %v1809_v28 = vmax.f32 %v1767_v34, 0.0  ;;  %v1927_v56 = vadd.f32 %v4395_v24, %v1926_v37  ;;  %v1681_v48 = vadd.f32 %v1680_v1, %v1592_v9  ;;  %v1604_v1 = vadd.f32 %v1603_v46, %v1515_v16 }
 0x2b1   :  { %v1828_v23 = vpack.c.bf16 %v1809_v28, %v1808_v0  ;;  %v1996_v27 = vmax.f32 %v1927_v56, 0.0 }
 0x2b3   :  { %1968 = vmatmul.bf16.gmra.mxu3 %v1828_v23  ;;  %v2024_v20 = vpack.c.bf16 %v1996_v27, %v1995_v32 }
 0x2b4   :  { %v1769_v2 = vpop.f32.mrf.mxu2 }
 0x2b5   :  { %2128 = vmatmul.bf16.gmra.mxu0 %v2024_v20  ;;  %v1770_v45 = vadd.f32 %v1769_v2, %v1681_v48 }
 0x2b6   :  { %v1682_v57 = vpop.f32.mrf.mxu1  ;;  %v1929_v62 = vpop.f32.mrf.mxu3 }
 0x2b7   :  { %v1683_v21 = vadd.f32 %v1682_v57, %v1594_v41  ;;  %v1930_v58 = vadd.f32 %v4395_v24, %v1929_v62  ;;  %v1810_v60 = vmax.f32 %v1770_v45, 0.0 }
 0x2b9   :  { %v1997_v8 = vmax.f32 %v1930_v58, 0.0 }
 0x2bc   :  { %v1771_v40 = vpop.f32.mrf.mxu2 }
 0x2bd   :  { %v1772_v30 = vadd.f32 %v1771_v40, %v1683_v21 }
 0x2be   :  { %v1685_v4 = vpop.f32.mrf.mxu1  ;;  %v1931_v35 = vpop.f32.mrf.mxu3 }
 0x2bf   :  { %v1811_v17 = vmax.f32 %v1772_v30, 0.0  ;;  %v1932_v12 = vadd.f32 %v4395_v24, %v1931_v35  ;;  %v1686_v18 = vadd.f32 %v1685_v4, %v1597_v33  ;;  %v4436_v35 = vld [vmem:[%s4493_s6] ss:$0 sm:$0xff]  ;;  %s3201_s6 = smov [#allocation2]  }
 0x2c0   :  { %s2230_s27 = sshll.u32 %s3201_s6, 4  ;;  %s2231_s27 = int_to_ptr.vmem [resolvable:$true] %s2230_s27 }
 0x2c1   :  { %v1829_v50 = vpack.c.bf16 %v1811_v17, %v1810_v60  ;;  %v1998_v39 = vmax.f32 %v1932_v12, 0.0 }
 0x2c3   :  { %v2025_v3 = vpack.c.bf16 %v1998_v39, %v1997_v8  ;;  %1973 = vmatmul.bf16.gmra.mxu3 %v1829_v50 }
 0x2c4   :  { %v1774_v44 = vpop.f32.mrf.mxu2 }
 0x2c5   :  { %2133 = vmatmul.bf16.gmra.mxu0 %v2025_v3  ;;  %v1775_v55 = vadd.f32 %v1774_v44, %v1686_v18 }
 0x2c6   :  { %v1687_v11 = vpop.f32.mrf.mxu1  ;;  %v1934_v63 = vpop.f32.mrf.mxu3 }
 0x2c7   :  { %v1688_v14 = vadd.f32 %v1687_v11, %v1599_v7  ;;  %v1935_v43 = vadd.f32 %v4395_v24, %v1934_v63  ;;  %v1812_v19 = vmax.f32 %v1775_v55, 0.0 }
 0x2c9   :  { %v1999_v29 = vmax.f32 %v1935_v43, 0.0 }
 0x2cc   :  { %v1776_v31 = vpop.f32.mrf.mxu2 }
 0x2cd   :  { %v1777_v52 = vadd.f32 %v1776_v31, %v1688_v14 }
 0x2ce   :  { %v1690_v53 = vpop.f32.mrf.mxu1  ;;  %v1936_v5 = vpop.f32.mrf.mxu3 }
 0x2cf   :  { %v1813_v6 = vmax.f32 %v1777_v52, 0.0  ;;  %v1937_v61 = vadd.f32 %v4395_v24, %v1936_v5  ;;  %v1691_v37 = vadd.f32 %v1690_v53, %v1602_v15 }
 0x2d1   :  { %v1830_v51 = vpack.c.bf16 %v1813_v6, %v1812_v19  ;;  %v2000_v38 = vmax.f32 %v1937_v61, 0.0 }
 0x2d3   :  { %v2026_v13 = vpack.c.bf16 %v2000_v38, %v1999_v29  ;;  %1978 = vmatmul.bf16.gmra.mxu3 %v1830_v51 }
 0x2d4   :  { %v1779_v26 = vpop.f32.mrf.mxu2 }
 0x2d5   :  { %2138 = vmatmul.bf16.gmra.mxu0 %v2026_v13  ;;  %v1780_v0 = vadd.f32 %v1779_v26, %v1691_v37 }
 0x2d6   :  { %v1939_v10 = vpop.f32.mrf.mxu3  ;;  %v1692_v34 = vpop.f32.mrf.mxu1 }
 0x2d7   :  { %v1693_v28 = vadd.f32 %v1692_v34, %v1604_v1  ;;  %v1940_v32 = vadd.f32 %v4395_v24, %v1939_v10  ;;  %v1814_v20 = vmax.f32 %v1780_v0, 0.0 }
 0x2d9   :  { %v2001_v22 = vmax.f32 %v1940_v32, 0.0 }
 0x2dc   :  { %v1781_v56 = vpop.f32.mrf.mxu2 }
 0x2dd   :  { %v1782_v23 = vadd.f32 %v1781_v56, %v1693_v28 }
 0x2de   :  { %v1941_v27 = vpop.f32.mrf.mxu3 }
 0x2df   :  { %v1815_v2 = vmax.f32 %v1782_v23, 0.0  ;;  %v1942_v36 = vadd.f32 %v4395_v24, %v1941_v27 }
 0x2e1   :  { %v1831_v42 = vpack.c.bf16 %v1815_v2, %v1814_v20  ;;  %v2002_v57 = vmax.f32 %v1942_v36, 0.0 }
 0x2e3   :  { %v2027_v62 = vpack.c.bf16 %v2002_v57, %v2001_v22  ;;  %1983 = vmatmul.bf16.gmra.mxu3 %v1831_v42 }
 0x2e5   :  { %2143 = vmatmul.bf16.gmra.mxu0 %v2027_v62 }
 0x2e6   :  { %v1944_v49 = vpop.f32.mrf.mxu3 }
 0x2e7   :  { %v1945_v9 = vadd.f32 %v4395_v24, %v1944_v49 }
 0x2e9   :  { %v2003_v48 = vmax.f32 %v1945_v9, 0.0 }
 0x2ee   :  { %v1946_v25 = vpop.f32.mrf.mxu3 }
 0x2ef   :  { %v1947_v41 = vadd.f32 %v4395_v24, %v1946_v25 }
 0x2f1   :  { %v2004_v45 = vmax.f32 %v1947_v41, 0.0 }
 0x2f3   :  { %v2028_v21 = vpack.c.bf16 %v2004_v45, %v2003_v48 }
 0x2f5   :  { %2148 = vmatmul.bf16.gmra.mxu0 %v2028_v21 }
 0x2f6   :  { %v1949_v40 = vpop.f32.mrf.mxu3 }
 0x2f7   :  { %v1950_v58 = vadd.f32 %v4395_v24, %v1949_v40 }
 0x2f9   :  { %v2005_v60 = vmax.f32 %v1950_v58, 0.0 }
 0x2fe   :  { %v1951_v30 = vpop.f32.mrf.mxu3 }
 0x2ff   :  { %v1952_v4 = vadd.f32 %v4395_v24, %v1951_v30 }
 0x301   :  { %v2006_v17 = vmax.f32 %v1952_v4, 0.0 }
 0x302   :  { %v2114_v12 = vpop.f32.mrf.mxu0 }
 0x303   :  { %v2029_v8 = vpack.c.bf16 %v2006_v17, %v2005_v60  ;;  %v2115_v50 = vadd.f32 %v4436_v35, %v2114_v12 }
 0x305   :  { %2194 = vst [vmem:[#allocation2] sm:$0xff] %v2115_v50  ;;  %2153 = vmatmul.bf16.gmra.mxu0 %v2029_v8 }
 0x306   :  { %v1954_v39 = vpop.f32.mrf.mxu3 }
 0x307   :  { %v1955_v44 = vadd.f32 %v4395_v24, %v1954_v39 }
 0x309   :  { %v2007_v63 = vmax.f32 %v1955_v44, 0.0 }
 0x30a   :  { %v2116_v59 = vpop.f32.mrf.mxu0 }
 0x30b   :  { %v2117_v3 = vadd.f32 %v4436_v35, %v2116_v59 }
 0x30d   :  { %2195 = vst [vmem:[#allocation2 + $0x8] sm:$0xff] %v2117_v3 }
 0x30e   :  { %v1956_v54 = vpop.f32.mrf.mxu3 }
 0x30f   :  { %v1957_v11 = vadd.f32 %v4395_v24, %v1956_v54 }
 0x311   :  { %v2008_v33 = vmax.f32 %v1957_v11, 0.0 }
 0x312   :  { %v2119_v7 = vpop.f32.mrf.mxu0 }
 0x313   :  { %v2030_v18 = vpack.c.bf16 %v2008_v33, %v2007_v63  ;;  %v2120_v55 = vadd.f32 %v4436_v35, %v2119_v7 }
 0x315   :  { %2196 = vst [vmem:[#allocation2 + $0x10] sm:$0xff] %v2120_v55  ;;  %2158 = vmatmul.bf16.gmra.mxu0 %v2030_v18 }
 0x316   :  { %v1959_v14 = vpop.f32.mrf.mxu3 }
 0x317   :  { %v1960_v43 = vadd.f32 %v4395_v24, %v1959_v14 }
 0x319   :  { %v2009_v5 = vmax.f32 %v1960_v43, 0.0 }
 0x31a   :  { %v2121_v47 = vpop.f32.mrf.mxu0 }
 0x31b   :  { %v2122_v31 = vadd.f32 %v4436_v35, %v2121_v47 }
 0x31d   :  { %2197 = vst [vmem:[#allocation2 + $0x18] sm:$0xff] %v2122_v31 }
 0x31e   :  { %v1961_v52 = vpop.f32.mrf.mxu3 }
 0x31f   :  { %v1962_v53 = vadd.f32 %v4395_v24, %v1961_v52 }
 0x321   :  { %v2010_v19 = vmax.f32 %v1962_v53, 0.0 }
 0x322   :  { %v2124_v6 = vpop.f32.mrf.mxu0 }
 0x323   :  { %v2031_v61 = vpack.c.bf16 %v2010_v19, %v2009_v5  ;;  %v2125_v29 = vadd.f32 %v4436_v35, %v2124_v6 }
 0x325   :  { %2198 = vst [vmem:[#allocation2 + $0x20] sm:$0xff] %v2125_v29  ;;  %2163 = vmatmul.bf16.gmra.mxu0 %v2031_v61 }
 0x326   :  { %v1964_v51 = vpop.f32.mrf.mxu3 }
 0x327   :  { %v1965_v26 = vadd.f32 %v4395_v24, %v1964_v51 }
 0x329   :  { %v2011_v10 = vmax.f32 %v1965_v26, 0.0 }
 0x32a   :  { %v2126_v38 = vpop.f32.mrf.mxu0 }
 0x32b   :  { %v2127_v13 = vadd.f32 %v4436_v35, %v2126_v38 }
 0x32d   :  { %2199 = vst [vmem:[#allocation2 + $0x28] sm:$0xff] %v2127_v13 }
 0x32e   :  { %v1966_v16 = vpop.f32.mrf.mxu3 }
 0x32f   :  { %v1967_v46 = vadd.f32 %v4395_v24, %v1966_v16 }
 0x331   :  { %v2012_v15 = vmax.f32 %v1967_v46, 0.0 }
 0x332   :  { %v2129_v34 = vpop.f32.mrf.mxu0 }
 0x333   :  { %v2032_v1 = vpack.c.bf16 %v2012_v15, %v2011_v10  ;;  %v2130_v37 = vadd.f32 %v4436_v35, %v2129_v34 }
 0x335   :  { %2200 = vst [vmem:[#allocation2 + $0x30] sm:$0xff] %v2130_v37  ;;  %2168 = vmatmul.bf16.gmra.mxu0 %v2032_v1 }
 0x336   :  { %v1969_v0 = vpop.f32.mrf.mxu3 }
 0x337   :  { %v1970_v32 = vadd.f32 %v4395_v24, %v1969_v0 }
 0x339   :  { %v2013_v20 = vmax.f32 %v1970_v32, 0.0 }
 0x33a   :  { %v2131_v28 = vpop.f32.mrf.mxu0 }
 0x33b   :  { %v2132_v56 = vadd.f32 %v4436_v35, %v2131_v28 }
 0x33d   :  { %2201 = vst [vmem:[#allocation2 + $0x38] sm:$0xff] %v2132_v56 }
 0x33e   :  { %v1971_v23 = vpop.f32.mrf.mxu3 }
 0x33f   :  { %v1972_v27 = vadd.f32 %v4395_v24, %v1971_v23 }
 0x341   :  { %v2014_v2 = vmax.f32 %v1972_v27, 0.0 }
 0x342   :  { %v2134_v36 = vpop.f32.mrf.mxu0 }
 0x343   :  { %v2033_v22 = vpack.c.bf16 %v2014_v2, %v2013_v20  ;;  %v2135_v42 = vadd.f32 %v4436_v35, %v2134_v36 }
 0x345   :  { %2202 = vst [vmem:[#allocation2 + $0x40] sm:$0xff] %v2135_v42  ;;  %2173 = vmatmul.bf16.gmra.mxu0 %v2033_v22 }
 0x346   :  { %v1974_v57 = vpop.f32.mrf.mxu3 }
 0x347   :  { %v1975_v9 = vadd.f32 %v4395_v24, %v1974_v57 }
 0x349   :  { %v2015_v48 = vmax.f32 %v1975_v9, 0.0 }
 0x34a   :  { %v2136_v62 = vpop.f32.mrf.mxu0 }
 0x34b   :  { %v2137_v49 = vadd.f32 %v4436_v35, %v2136_v62 }
 0x34d   :  { %2203 = vst [vmem:[#allocation2 + $0x48] sm:$0xff] %v2137_v49 }
 0x34e   :  { %v1976_v25 = vpop.f32.mrf.mxu3 }
 0x34f   :  { %v1977_v41 = vadd.f32 %v4395_v24, %v1976_v25 }
 0x351   :  { %v2016_v45 = vmax.f32 %v1977_v41, 0.0 }
 0x352   :  { %v2139_v21 = vpop.f32.mrf.mxu0 }
 0x353   :  { %v2034_v40 = vpack.c.bf16 %v2016_v45, %v2015_v48  ;;  %v2140_v58 = vadd.f32 %v4436_v35, %v2139_v21 }
 0x355   :  { %2204 = vst [vmem:[#allocation2 + $0x50] sm:$0xff] %v2140_v58  ;;  %2178 = vmatmul.bf16.gmra.mxu0 %v2034_v40 }
 0x356   :  { %v1979_v30 = vpop.f32.mrf.mxu3 }
 0x357   :  { %v1980_v17 = vadd.f32 %v4395_v24, %v1979_v30 }
 0x359   :  { %v2017_v50 = vmax.f32 %v1980_v17, 0.0 }
 0x35a   :  { %v2141_v4 = vpop.f32.mrf.mxu0 }
 0x35b   :  { %v2142_v60 = vadd.f32 %v4436_v35, %v2141_v4 }
 0x35d   :  { %2205 = vst [vmem:[#allocation2 + $0x58] sm:$0xff] %v2142_v60 }
 0x35e   :  { %v1981_v12 = vpop.f32.mrf.mxu3 }
 0x35f   :  { %v1982_v8 = vadd.f32 %v4395_v24, %v1981_v12 }
 0x361   :  { %v2018_v39 = vmax.f32 %v1982_v8, 0.0 }
 0x362   :  { %v2144_v59 = vpop.f32.mrf.mxu0 }
 0x363   :  { %v2035_v3 = vpack.c.bf16 %v2018_v39, %v2017_v50  ;;  %v2145_v44 = vadd.f32 %v4436_v35, %v2144_v59 }
 0x365   :  { %2206 = vst [vmem:[#allocation2 + $0x60] sm:$0xff] %v2145_v44  ;;  %2183 = vmatmul.bf16.gmra.mxu0 %v2035_v3 }
 0x366   :  { %v1984_v54 = vpop.f32.mrf.mxu3 }
 0x367   :  { %v1985_v33 = vadd.f32 %v4395_v24, %v1984_v54 }
 0x369   :  { %v2019_v55 = vmax.f32 %v1985_v33, 0.0 }
 0x36a   :  { %v2146_v11 = vpop.f32.mrf.mxu0 }
 0x36b   :  { %v2147_v63 = vadd.f32 %v4436_v35, %v2146_v11 }
 0x36d   :  { %2207 = vst [vmem:[#allocation2 + $0x68] sm:$0xff] %v2147_v63 }
 0x36e   :  { %v1986_v7 = vpop.f32.mrf.mxu3 }
 0x36f   :  { %v1987_v18 = vadd.f32 %v4395_v24, %v1986_v7 }
 0x371   :  { %v2020_v14 = vmax.f32 %v1987_v18, 0.0 }
 0x372   :  { %v2149_v47 = vpop.f32.mrf.mxu0 }
 0x373   :  { %v2036_v31 = vpack.c.bf16 %v2020_v14, %v2019_v55  ;;  %v2150_v43 = vadd.f32 %v4436_v35, %v2149_v47 }
 0x375   :  { %2208 = vst [vmem:[#allocation2 + $0x70] sm:$0xff] %v2150_v43  ;;  %2188 = vmatmul.bf16.gmra.mxu0 %v2036_v31 }
 0x37a   :  { %v2151_v52 = vpop.f32.mrf.mxu0 }
 0x37b   :  { %v2152_v53 = vadd.f32 %v4436_v35, %v2151_v52 }
 0x37d   :  { %2209 = vst [vmem:[#allocation2 + $0x78] sm:$0xff] %v2152_v53 }
 0x382   :  { %v2154_v5 = vpop.f32.mrf.mxu0 }
 0x383   :  { %v2155_v19 = vadd.f32 %v4436_v35, %v2154_v5 }
 0x385   :  { %2210 = vst [vmem:[#allocation2 + $0x80] sm:$0xff] %v2155_v19 }
 0x38a   :  { %v2156_v6 = vpop.f32.mrf.mxu0 }
 0x38b   :  { %v2157_v61 = vadd.f32 %v4436_v35, %v2156_v6 }
 0x38d   :  { %2211 = vst [vmem:[#allocation2 + $0x88] sm:$0xff] %v2157_v61 }
 0x392   :  { %v2159_v24 = vpop.f32.mrf.mxu0 }
 0x393   :  { %v2160_v29 = vadd.f32 %v4436_v35, %v2159_v24 }
 0x395   :  { %2212 = vst [vmem:[#allocation2 + $0x90] sm:$0xff] %v2160_v29 }
 0x39a   :  { %v2161_v51 = vpop.f32.mrf.mxu0 }
 0x39b   :  { %v2162_v38 = vadd.f32 %v4436_v35, %v2161_v51 }
 0x39d   :  { %2213 = vst [vmem:[#allocation2 + $0x98] sm:$0xff] %v2162_v38 }
 0x3a2   :  { %v2164_v13 = vpop.f32.mrf.mxu0 }
 0x3a3   :  { %v2165_v26 = vadd.f32 %v4436_v35, %v2164_v13 }
 0x3a5   :  { %2214 = vst [vmem:[#allocation2 + $0xa0] sm:$0xff] %v2165_v26 }
 0x3aa   :  { %v2166_v16 = vpop.f32.mrf.mxu0 }
 0x3ab   :  { %v2167_v46 = vadd.f32 %v4436_v35, %v2166_v16 }
 0x3ad   :  { %2215 = vst [vmem:[#allocation2 + $0xa8] sm:$0xff] %v2167_v46 }
 0x3b2   :  { %v2169_v10 = vpop.f32.mrf.mxu0 }
 0x3b3   :  { %v2170_v15 = vadd.f32 %v4436_v35, %v2169_v10 }
 0x3b5   :  { %2216 = vst [vmem:[#allocation2 + $0xb0] sm:$0xff] %v2170_v15 }
 0x3ba   :  { %v2171_v34 = vpop.f32.mrf.mxu0 }
 0x3bb   :  { %v2172_v1 = vadd.f32 %v4436_v35, %v2171_v34 }
 0x3bd   :  { %2217 = vst [vmem:[#allocation2 + $0xb8] sm:$0xff] %v2172_v1 }
 0x3c2   :  { %v2174_v37 = vpop.f32.mrf.mxu0 }
 0x3c3   :  { %v2175_v0 = vadd.f32 %v4436_v35, %v2174_v37 }
 0x3c5   :  { %2218 = vst [vmem:[#allocation2 + $0xc0] sm:$0xff] %v2175_v0 }
 0x3ca   :  { %v2176_v28 = vpop.f32.mrf.mxu0 }
 0x3cb   :  { %v2177_v56 = vadd.f32 %v4436_v35, %v2176_v28 }
 0x3cd   :  { %2219 = vst [vmem:[#allocation2 + $0xc8] sm:$0xff] %v2177_v56 }
 0x3d2   :  { %v2179_v32 = vpop.f32.mrf.mxu0 }
 0x3d3   :  { %v2180_v23 = vadd.f32 %v4436_v35, %v2179_v32 }
 0x3d5   :  { %2220 = vst [vmem:[#allocation2 + $0xd0] sm:$0xff] %v2180_v23 }
 0x3da   :  { %v2181_v27 = vpop.f32.mrf.mxu0 }
 0x3db   :  { %v2182_v20 = vadd.f32 %v4436_v35, %v2181_v27 }
 0x3dd   :  { %2221 = vst [vmem:[#allocation2 + $0xd8] sm:$0xff] %v2182_v20 }
 0x3e2   :  { %v2184_v2 = vpop.f32.mrf.mxu0 }
 0x3e3   :  { %v2185_v36 = vadd.f32 %v4436_v35, %v2184_v2 }
 0x3e5   :  { %2222 = vst [vmem:[#allocation2 + $0xe0] sm:$0xff] %v2185_v36 }
 0x3ea   :  { %v2186_v22 = vpop.f32.mrf.mxu0 }
 0x3eb   :  { %v2187_v42 = vadd.f32 %v4436_v35, %v2186_v22 }
 0x3ed   :  { %2223 = vst [vmem:[#allocation2 + $0xe8] sm:$0xff] %v2187_v42 }
 0x3f2   :  { %v2189_v57 = vpop.f32.mrf.mxu0 }
 0x3f3   :  { %v2190_v62 = vadd.f32 %v4436_v35, %v2189_v57 }
 0x3f5   :  { %2224 = vst [vmem:[#allocation2 + $0xf0] sm:$0xff] %v2190_v62 }
 0x3fa   :  { %v2191_v49 = vpop.f32.mrf.mxu0 }
 0x3fb   :  { %v2192_v9 = vadd.f32 %v4436_v35, %v2191_v49 }
 0x3fd   :  { %2225 = vst [vmem:[#allocation2 + $0xf8] sm:$0xff] %v2192_v9 }
 0x3fe   :  { %2238 = dma.vmem_to_hbm [thread:$0]  %s2231_s27, 4096, %s2233_s29, [#allocation3], %s3202_s30, %s3202_s30, %s3203_s8  }
 0x3ff   :  { %3199 = dma.done.wait [#allocation3], 4096  }
 0x400   :  { %3200 = vsyncadd [#allocation3], 4294963200 }
 0x401   :  { %2243 = vsyncpa [#allocation3], 1 }

</bundles_post_ra>
